<compile_context>
chip_gen: v7x
topology: tpu7x:2x2x1
jax: 0.10.0
libtpu: 0.0.40
codegen_flags: <defaults>
</compile_context>

<pallas_src>
import functools
import math

import jax
import jax.numpy as jnp
from jax import lax
from jax.experimental import pallas as pl
from jax.experimental.pallas import tpu as pltpu


def _convlstm_kernel(g_ref, w_ref, b_ref, mask_ref, c_ref, peep_ref,
                     ch_ref, cc_ref, *, hidden, k, W, block_m):
    """One (batch, row-block) step of the ConvLSTM cell (transposed layout).

    g_ref    : (1, 1, C, block_m + halo) bf16  flat-padded [x|h] slab (C=Cin+Chid)
    w_ref    : (k*k, 4*hidden, C)        bf16  per-tap fused gate weights
    b_ref    : (4*hidden, 1)             f32   Wx* biases (per gate channel)
    mask_ref : (k, block_m)              bf16  width-validity masks per tap column
    c_ref    : (1, hidden, block_m)      f32   cell state (channel-first)
    peep_ref : (3*hidden, block_m)       f32   packed [Wci | Wcf | Wco]
    ch_ref, cc_ref : (1, hidden, block_m) f32  outputs (channel-first)
    """
    four_h = 4 * hidden
    p = (k - 1) // 2

    # Bias-initialized f32 accumulator: gates on sublanes, spatial on lanes.
    acc = jnp.broadcast_to(b_ref[...], (four_h, block_m)).astype(jnp.float32)

    masks = mask_ref[...]                       # (k, block_m) bf16

    # k*k shifted matmuls, one accumulation chain into the single f32 accumulator.
    # The raw slab is read once (no 9x im2col HBM stream); each tap is a static,
    # unaligned lane slice of the VMEM-resident block.
    for di in range(k):
        for dj in range(k):
            s = di * W + dj                     # static flat offset of this tap
            sl = g_ref[0, 0, :, pl.ds(s, block_m)]      # (C, block_m) bf16
            if dj != p:
                # Zero the column wrap-around the flat-shift trick would pull in
                # from the adjacent image row (SAME zero padding in width).
                sl = sl * masks[dj:dj + 1, :]
            acc = acc + jnp.dot(w_ref[di * k + dj], sl,
                                preferred_element_type=jnp.float32)

    c = c_ref[0]                                # (hidden, block_m) f32
    peep = peep_ref[...]                        # (3*hidden, block_m) f32

    gi = acc[0 * hidden:1 * hidden]
    gf = acc[1 * hidden:2 * hidden]
    gg = acc[2 * hidden:3 * hidden]
    go = acc[3 * hidden:4 * hidden]
    wci = peep[0 * hidden:1 * hidden]
    wcf = peep[1 * hidden:2 * hidden]
    wco = peep[2 * hidden:3 * hidden]

    # Fused epilogue on full 128-lane vregs (sigmoid/tanh go to the EUP and
    # overlap the next pipelined step's MXU/DMA work).
    ci = jax.nn.sigmoid(gi + c * wci)
    cf = jax.nn.sigmoid(gf + c * wcf)
    cc = cf * c + ci * jnp.tanh(gg)
    co = jax.nn.sigmoid(go + cc * wco)

    cc_ref[0] = cc.astype(cc_ref.dtype)
    ch_ref[0] = (co * jnp.tanh(cc)).astype(ch_ref.dtype)


def conv_lstm_cell_pallas(x, h, c, params, kernel_size, *, block_m=None,
                          matmul_dtype=jnp.bfloat16):
    """x, h, c are NCHW (PyTorch convention); returns (ch, cc) in NCHW f32."""
    Wx, Wh, b, Wci, Wcf, Wco = params
    B, Cin, H, W = x.shape
    Chid = h.shape[1]
    k = kernel_size
    p = (k - 1) // 2
    M = H * W
    C = Cin + Chid
    four_h = 4 * Chid

    if block_m is None:
        if M <= 512:
            block_m = M                 # whole image per batch: grid=(B, 1)
        else:
            block_m = next((cand for cand in (1024, 512, 256, 128)
                            if M % cand == 0), M)
    assert M % block_m == 0, "block_m must divide H*W"
    n_blk = M // block_m

    halo = 2 * p * W + 2 * p            # extra flat elements a row block needs
    Lb = block_m + halo

    # ---- wrapper layout plumbing (bf16 FIRST, channel-first throughout) ----
    xh = jnp.concatenate([x.astype(matmul_dtype), h.astype(matmul_dtype)],
                         axis=1).reshape(B, C, M)              # (B, C, H*W)
    # H zero-padding + flat-shift padding collapse into one flat pad of p*W+p.
    g = jnp.pad(xh, ((0, 0), (0, 0), (p * W + p, p * W + p)))  # (B, C, M+halo)
    # Per-row-block overlapping windows: only the tiny halo is duplicated, so the
    # main HBM read stream stays ~1x the raw data (vs ~9x for im2col).
    gb = jnp.stack([g[:, :, j * block_m: j * block_m + Lb] for j in range(n_blk)],
                   axis=1)                                     # (B, n_blk, C, Lb)

    # Fused per-tap gate weights: (k, k, C, 4*Chid) HWIO -> (k*k, 4*Chid, C).
    w_taps = jnp.concatenate([Wx, Wh], axis=2)
    w_taps = jnp.transpose(w_taps, (0, 1, 3, 2)).reshape(k * k, four_h, C)
    w_taps = w_taps.astype(matmul_dtype)

    b2 = b.reshape(four_h, 1).astype(jnp.float32)

    # Width-validity masks per tap column offset dj (global output positions).
    w_idx = jnp.arange(M, dtype=jnp.int32) % W
    masks = jnp.stack([((w_idx + dj - p >= 0) & (w_idx + dj - p < W))
                       for dj in range(k)]).astype(matmul_dtype)   # (k, M)

    c_flat = c.reshape(B, Chid, M).astype(jnp.float32)
    peep = jnp.concatenate([Wci, Wcf, Wco], axis=0).reshape(3 * Chid, M)
    peep = peep.astype(jnp.float32)

    kernel = functools.partial(_convlstm_kernel, hidden=Chid, k=k, W=W,
                               block_m=block_m)

    # Explicit VMEM budget (double-buffered inputs/outputs + headroom); v5e's
    # scoped default is only 16 MiB, v7x's physical VMEM is 64 MiB.
    est = 2 * (C * Lb * 2 + k * k * four_h * C * 2 + four_h * 4
               + k * block_m * 2 + Chid * block_m * 4
               + 3 * Chid * block_m * 4 + 2 * Chid * block_m * 4)
    vmem_limit = int(min(max(2 * est + (4 << 20), 8 << 20), 64 << 20))

    # TODO(synk): grid-invariant w_taps/b2 could use pipeline_mode=pl.Buffered(1)
    # to drop the redundant second buffer once Kp/Chid grow toward v7x's 64 MiB.
    grid_spec = pltpu.PrefetchScalarGridSpec(
        num_scalar_prefetch=0,
        grid=(B, n_blk),
        in_specs=[
            pl.BlockSpec((1, 1, C, Lb), lambda bb, mm: (bb, mm, 0, 0)),
            pl.BlockSpec((k * k, four_h, C), lambda bb, mm: (0, 0, 0)),
            pl.BlockSpec((four_h, 1), lambda bb, mm: (0, 0)),
            pl.BlockSpec((k, block_m), lambda bb, mm: (0, mm)),
            pl.BlockSpec((1, Chid, block_m), lambda bb, mm: (bb, 0, mm)),
            pl.BlockSpec((3 * Chid, block_m), lambda bb, mm: (0, mm)),
        ],
        out_specs=[
            pl.BlockSpec((1, Chid, block_m), lambda bb, mm: (bb, 0, mm)),
            pl.BlockSpec((1, Chid, block_m), lambda bb, mm: (bb, 0, mm)),
        ],
    )

    ch_f, cc_f = pl.pallas_call(
        kernel,
        out_shape=(jax.ShapeDtypeStruct((B, Chid, M), jnp.float32),
                   jax.ShapeDtypeStruct((B, Chid, M), jnp.float32)),
        grid_spec=grid_spec,
        compiler_params=pltpu.CompilerParams(
            dimension_semantics=("parallel", "parallel"),
            vmem_limit_bytes=vmem_limit),
    )(gb, w_taps, b2, masks, c_flat, peep)

    # Outputs are already channel-first; a reshape (no transpose) restores NCHW.
    return ch_f.reshape(B, Chid, H, W), cc_f.reshape(B, Chid, H, W)


def conv_lstm_cell_ref(x, h, c, params, *, quantize_matmul_inputs=False):
    """Pure-JAX reference (lax.conv, HIGHEST precision), same NCHW API.

    quantize_matmul_inputs=True rounds x/h/Wx/Wh to bf16 (and back to f32)
    before the convolutions, mirroring the rounding the Pallas kernel applies
    to its MXU operands (which accumulate in f32).
    """
    Wx, Wh, b, Wci, Wcf, Wco = params
    if quantize_matmul_inputs:
        q = lambda a: a.astype(jnp.bfloat16).astype(jnp.float32)
        x, h, Wx, Wh = q(x), q(h), q(Wx), q(Wh)
    xn = jnp.transpose(x, (0, 2, 3, 1))
    hn = jnp.transpose(h, (0, 2, 3, 1))
    cn = jnp.transpose(c, (0, 2, 3, 1))
    wci = jnp.transpose(Wci, (1, 2, 0))[None]
    wcf = jnp.transpose(Wcf, (1, 2, 0))[None]
    wco = jnp.transpose(Wco, (1, 2, 0))[None]
    dn = ('NHWC', 'HWIO', 'NHWC')
    acc = lax.conv_general_dilated(xn, Wx, (1, 1), 'SAME',
                                   dimension_numbers=dn,
                                   precision=lax.Precision.HIGHEST)
    acc = acc + lax.conv_general_dilated(hn, Wh, (1, 1), 'SAME',
                                         dimension_numbers=dn,
                                         precision=lax.Precision.HIGHEST)
    acc = acc + b.reshape(1, 1, 1, -1)
    gi, gf, gg, go = jnp.split(acc, 4, axis=-1)
    ci = jax.nn.sigmoid(gi + cn * wci)
    cf = jax.nn.sigmoid(gf + cn * wcf)
    cc = cf * cn + ci * jnp.tanh(gg)
    co = jax.nn.sigmoid(go + cc * wco)
    ch = co * jnp.tanh(cc)
    return (jnp.transpose(ch, (0, 3, 1, 2)),
            jnp.transpose(cc, (0, 3, 1, 2)))


def make_params(key, input_channels, hidden_channels, kernel_size, H, W):
    """Deterministic synthetic weights (HWIO, gates stacked on O as [i|f|c|o]).

    Matches ConvLSTMCell.__init__: four Wx* convs with bias, four Wh* convs
    without bias, and peephole Wci/Wcf/Wco of shape (hidden, H, W) per channel
    (init_hidden creates them as zeros; small nonzero values exercise the path).
    """
    k = kernel_size
    keys = jax.random.split(key, 15)
    sx = 1.0 / math.sqrt(input_channels * k * k)
    sh = 1.0 / math.sqrt(hidden_channels * k * k)

    def u(kk, shape, s):
        return jax.random.uniform(kk, shape, jnp.float32, -s, s)

    Wx = jnp.concatenate(
        [u(keys[i], (k, k, input_channels, hidden_channels), sx)
         for i in range(4)], axis=-1)                        # (k,k,Cin,4*Chid)
    Wh = jnp.concatenate(
        [u(keys[4 + i], (k, k, hidden_channels, hidden_channels), sh)
         for i in range(4)], axis=-1)                        # (k,k,Chid,4*Chid)
    b = jnp.concatenate(
        [u(keys[8 + i], (hidden_channels,), sx) for i in range(4)],
        axis=-1).reshape(1, 4 * hidden_channels)             # (1,4*Chid)
    Wci = 0.1 * jax.random.normal(keys[12], (hidden_channels, H, W), jnp.float32)
    Wcf = 0.1 * jax.random.normal(keys[13], (hidden_channels, H, W), jnp.float32)
    Wco = 0.1 * jax.random.normal(keys[14], (hidden_channels, H, W), jnp.float32)
    return Wx, Wh, b, Wci, Wcf, Wco


if __name__ == "__main__":
    B, Cin, Chid, H, W, k = 2, 4, 32, 16, 16, 3

    key = jax.random.PRNGKey(0)
    kx, kh, kc, kp = jax.random.split(key, 4)
    x = jax.random.normal(kx, (B, Cin, H, W), jnp.float32)
    h = jax.random.normal(kh, (B, Chid, H, W), jnp.float32)
    c = jax.random.normal(kc, (B, Chid, H, W), jnp.float32)
    params = make_params(kp, Cin, Chid, k, H, W)

    # jit so the wrapper's cast/pad/concat layout ops fuse with the pallas_call.
    run = jax.jit(lambda x, h, c, params: conv_lstm_cell_pallas(x, h, c, params, k))
    ch, cc = run(x, h, c, params)
    jax.block_until_ready((ch, cc))
    assert ch.shape == (B, Chid, H, W) and cc.shape == (B, Chid, H, W)

    # Tight structural check: reference computed with the SAME bf16 rounding of
    # the conv operands (kernel multiplies bf16 and accumulates in f32).
    ch_q, cc_q = conv_lstm_cell_ref(x, h, c, params, quantize_matmul_inputs=True)
    assert jnp.allclose(ch, ch_q, atol=1e-3, rtol=1e-3)
    assert jnp.allclose(cc, cc_q, atol=1e-3, rtol=1e-3)

    # Loose end-to-end check vs the full-f32 HIGHEST-precision reference; the
    # tolerance is the bf16 quantization bound of the matmul operands.
    ch_f, cc_f = conv_lstm_cell_ref(x, h, c, params)
    assert jnp.allclose(ch, ch_f, atol=3e-2, rtol=3e-2)
    assert jnp.allclose(cc, cc_f, atol=3e-2, rtol=3e-2)

    print("KERNEL_OK")
</pallas_src>

<mosaic_0001>
module attributes {stable_mosaic.version = 11 : i64} {
  func.func @_convlstm_kernel(%arg0: i32, %arg1: i32, %arg2: memref<1x1x36x290xbf16, #tpu.memory_space<vmem>>, %arg3: memref<9x128x36xbf16, #tpu.memory_space<vmem>>, %arg4: memref<128x1xf32, #tpu.memory_space<vmem>>, %arg5: memref<3x256xbf16, #tpu.memory_space<vmem>>, %arg6: memref<1x32x256xf32, #tpu.memory_space<vmem>>, %arg7: memref<96x256xf32, #tpu.memory_space<vmem>>, %arg8: memref<1x32x256xf32, #tpu.memory_space<vmem>>, %arg9: memref<1x32x256xf32, #tpu.memory_space<vmem>>) attributes {dimension_semantics = [#tpu.dimension_semantics<parallel>, #tpu.dimension_semantics<parallel>], iteration_bounds = array<i64: 2, 1>, scalar_prefetch = 0 : i64, scratch_operands = 0 : i64, tpu.core_type = #tpu.core_type<tc>, window_params = [{transform_indices = @transform_0, window_bounds = array<i64: 1, 1, 36, 290>}, {pipeline_mode = #tpu.pipeline_mode<synchronous>, transform_indices = @transform_1, window_bounds = array<i64: 9, 128, 36>}, {pipeline_mode = #tpu.pipeline_mode<synchronous>, transform_indices = @transform_2, window_bounds = array<i64: 128, 1>}, {transform_indices = @transform_3, window_bounds = array<i64: 3, 256>}, {transform_indices = @transform_4, window_bounds = array<i64: 1, 32, 256>}, {transform_indices = @transform_5, window_bounds = array<i64: 96, 256>}, {transform_indices = @transform_6, window_bounds = array<i64: 1, 32, 256>}, {transform_indices = @transform_7, window_bounds = array<i64: 1, 32, 256>}]} {
    %c0 = arith.constant 0 : index
    %c0_0 = arith.constant 0 : index
    %0 = vector.load %arg4[%c0, %c0_0] : memref<128x1xf32, #tpu.memory_space<vmem>>, vector<128x1xf32>
    %1 = vector.shape_cast %0 : vector<128x1xf32> to vector<128x1xf32>
    %2 = vector.broadcast %1 : vector<128x1xf32> to vector<128x256xf32>
    %c0_1 = arith.constant 0 : index
    %c0_2 = arith.constant 0 : index
    %3 = vector.load %arg5[%c0_1, %c0_2] : memref<3x256xbf16, #tpu.memory_space<vmem>>, vector<3x256xbf16>
    %c0_3 = arith.constant 0 : index
    %c0_4 = arith.constant 0 : index
    %c0_5 = arith.constant 0 : index
    %c0_6 = arith.constant 0 : index
    %4 = vector.load %arg2[%c0_3, %c0_4, %c0_5, %c0_6] : memref<1x1x36x290xbf16, #tpu.memory_space<vmem>>, vector<1x1x36x256xbf16>
    %5 = vector.shape_cast %4 : vector<1x1x36x256xbf16> to vector<36x256xbf16>
    %6 = vector.extract_strided_slice %3 {offsets = [0, 0], sizes = [1, 256], strides = [1, 1]} : vector<3x256xbf16> to vector<1x256xbf16>
    %7 = vector.broadcast %6 : vector<1x256xbf16> to vector<36x256xbf16>
    %8 = arith.mulf %5, %7 : vector<36x256xbf16>
    %c0_7 = arith.constant 0 : index
    %c0_8 = arith.constant 0 : index
    %c0_9 = arith.constant 0 : index
    %9 = vector.load %arg3[%c0_7, %c0_8, %c0_9] : memref<9x128x36xbf16, #tpu.memory_space<vmem>>, vector<1x128x36xbf16>
    %10 = vector.shape_cast %9 : vector<1x128x36xbf16> to vector<128x36xbf16>
    %cst = arith.constant dense<0.000000e+00> : vector<128x256xf32>
    %11 = tpu.matmul %10, %8, %cst {dimension_numbers = #tpu.dot_dimension_numbers<[1], [0], [0], [1], [0, 0, 1, 1], [], []>} : vector<128x36xbf16>, vector<36x256xbf16>, vector<128x256xf32> -> vector<128x256xf32>
    %12 = arith.addf %2, %11 : vector<128x256xf32>
    %c0_10 = arith.constant 0 : index
    %c0_11 = arith.constant 0 : index
    %c0_12 = arith.constant 0 : index
    %c1 = arith.constant 1 : index
    %13 = vector.load %arg2[%c0_10, %c0_11, %c0_12, %c1] : memref<1x1x36x290xbf16, #tpu.memory_space<vmem>>, vector<1x1x36x256xbf16>
    %14 = vector.shape_cast %13 : vector<1x1x36x256xbf16> to vector<36x256xbf16>
    %c1_13 = arith.constant 1 : index
    %c0_14 = arith.constant 0 : index
    %c0_15 = arith.constant 0 : index
    %15 = vector.load %arg3[%c1_13, %c0_14, %c0_15] : memref<9x128x36xbf16, #tpu.memory_space<vmem>>, vector<1x128x36xbf16>
    %16 = vector.shape_cast %15 : vector<1x128x36xbf16> to vector<128x36xbf16>
    %cst_16 = arith.constant dense<0.000000e+00> : vector<128x256xf32>
    %17 = tpu.matmul %16, %14, %cst_16 {dimension_numbers = #tpu.dot_dimension_numbers<[1], [0], [0], [1], [0, 0, 1, 1], [], []>} : vector<128x36xbf16>, vector<36x256xbf16>, vector<128x256xf32> -> vector<128x256xf32>
    %18 = arith.addf %12, %17 : vector<128x256xf32>
    %c0_17 = arith.constant 0 : index
    %c0_18 = arith.constant 0 : index
    %c0_19 = arith.constant 0 : index
    %c2 = arith.constant 2 : index
    %19 = vector.load %arg2[%c0_17, %c0_18, %c0_19, %c2] : memref<1x1x36x290xbf16, #tpu.memory_space<vmem>>, vector<1x1x36x256xbf16>
    %20 = vector.shape_cast %19 : vector<1x1x36x256xbf16> to vector<36x256xbf16>
    %21 = vector.extract_strided_slice %3 {offsets = [2, 0], sizes = [1, 256], strides = [1, 1]} : vector<3x256xbf16> to vector<1x256xbf16>
    %22 = vector.broadcast %21 : vector<1x256xbf16> to vector<36x256xbf16>
    %23 = arith.mulf %20, %22 : vector<36x256xbf16>
    %c2_20 = arith.constant 2 : index
    %c0_21 = arith.constant 0 : index
    %c0_22 = arith.constant 0 : index
    %24 = vector.load %arg3[%c2_20, %c0_21, %c0_22] : memref<9x128x36xbf16, #tpu.memory_space<vmem>>, vector<1x128x36xbf16>
    %25 = vector.shape_cast %24 : vector<1x128x36xbf16> to vector<128x36xbf16>
    %cst_23 = arith.constant dense<0.000000e+00> : vector<128x256xf32>
    %26 = tpu.matmul %25, %23, %cst_23 {dimension_numbers = #tpu.dot_dimension_numbers<[1], [0], [0], [1], [0, 0, 1, 1], [], []>} : vector<128x36xbf16>, vector<36x256xbf16>, vector<128x256xf32> -> vector<128x256xf32>
    %27 = arith.addf %18, %26 : vector<128x256xf32>
    %c0_24 = arith.constant 0 : index
    %c0_25 = arith.constant 0 : index
    %c0_26 = arith.constant 0 : index
    %c16 = arith.constant 16 : index
    %28 = vector.load %arg2[%c0_24, %c0_25, %c0_26, %c16] : memref<1x1x36x290xbf16, #tpu.memory_space<vmem>>, vector<1x1x36x256xbf16>
    %29 = vector.shape_cast %28 : vector<1x1x36x256xbf16> to vector<36x256xbf16>
    %30 = vector.extract_strided_slice %3 {offsets = [0, 0], sizes = [1, 256], strides = [1, 1]} : vector<3x256xbf16> to vector<1x256xbf16>
    %31 = vector.broadcast %30 : vector<1x256xbf16> to vector<36x256xbf16>
    %32 = arith.mulf %29, %31 : vector<36x256xbf16>
    %c3 = arith.constant 3 : index
    %c0_27 = arith.constant 0 : index
    %c0_28 = arith.constant 0 : index
    %33 = vector.load %arg3[%c3, %c0_27, %c0_28] : memref<9x128x36xbf16, #tpu.memory_space<vmem>>, vector<1x128x36xbf16>
    %34 = vector.shape_cast %33 : vector<1x128x36xbf16> to vector<128x36xbf16>
    %cst_29 = arith.constant dense<0.000000e+00> : vector<128x256xf32>
    %35 = tpu.matmul %34, %32, %cst_29 {dimension_numbers = #tpu.dot_dimension_numbers<[1], [0], [0], [1], [0, 0, 1, 1], [], []>} : vector<128x36xbf16>, vector<36x256xbf16>, vector<128x256xf32> -> vector<128x256xf32>
    %36 = arith.addf %27, %35 : vector<128x256xf32>
    %c0_30 = arith.constant 0 : index
    %c0_31 = arith.constant 0 : index
    %c0_32 = arith.constant 0 : index
    %c17 = arith.constant 17 : index
    %37 = vector.load %arg2[%c0_30, %c0_31, %c0_32, %c17] : memref<1x1x36x290xbf16, #tpu.memory_space<vmem>>, vector<1x1x36x256xbf16>
    %38 = vector.shape_cast %37 : vector<1x1x36x256xbf16> to vector<36x256xbf16>
    %c4 = arith.constant 4 : index
    %c0_33 = arith.constant 0 : index
    %c0_34 = arith.constant 0 : index
    %39 = vector.load %arg3[%c4, %c0_33, %c0_34] : memref<9x128x36xbf16, #tpu.memory_space<vmem>>, vector<1x128x36xbf16>
    %40 = vector.shape_cast %39 : vector<1x128x36xbf16> to vector<128x36xbf16>
    %cst_35 = arith.constant dense<0.000000e+00> : vector<128x256xf32>
    %41 = tpu.matmul %40, %38, %cst_35 {dimension_numbers = #tpu.dot_dimension_numbers<[1], [0], [0], [1], [0, 0, 1, 1], [], []>} : vector<128x36xbf16>, vector<36x256xbf16>, vector<128x256xf32> -> vector<128x256xf32>
    %42 = arith.addf %36, %41 : vector<128x256xf32>
    %c0_36 = arith.constant 0 : index
    %c0_37 = arith.constant 0 : index
    %c0_38 = arith.constant 0 : index
    %c18 = arith.constant 18 : index
    %43 = vector.load %arg2[%c0_36, %c0_37, %c0_38, %c18] : memref<1x1x36x290xbf16, #tpu.memory_space<vmem>>, vector<1x1x36x256xbf16>
    %44 = vector.shape_cast %43 : vector<1x1x36x256xbf16> to vector<36x256xbf16>
    %45 = vector.extract_strided_slice %3 {offsets = [2, 0], sizes = [1, 256], strides = [1, 1]} : vector<3x256xbf16> to vector<1x256xbf16>
    %46 = vector.broadcast %45 : vector<1x256xbf16> to vector<36x256xbf16>
    %47 = arith.mulf %44, %46 : vector<36x256xbf16>
    %c5 = arith.constant 5 : index
    %c0_39 = arith.constant 0 : index
    %c0_40 = arith.constant 0 : index
    %48 = vector.load %arg3[%c5, %c0_39, %c0_40] : memref<9x128x36xbf16, #tpu.memory_space<vmem>>, vector<1x128x36xbf16>
    %49 = vector.shape_cast %48 : vector<1x128x36xbf16> to vector<128x36xbf16>
    %cst_41 = arith.constant dense<0.000000e+00> : vector<128x256xf32>
    %50 = tpu.matmul %49, %47, %cst_41 {dimension_numbers = #tpu.dot_dimension_numbers<[1], [0], [0], [1], [0, 0, 1, 1], [], []>} : vector<128x36xbf16>, vector<36x256xbf16>, vector<128x256xf32> -> vector<128x256xf32>
    %51 = arith.addf %42, %50 : vector<128x256xf32>
    %c0_42 = arith.constant 0 : index
    %c0_43 = arith.constant 0 : index
    %c0_44 = arith.constant 0 : index
    %c32 = arith.constant 32 : index
    %52 = vector.load %arg2[%c0_42, %c0_43, %c0_44, %c32] : memref<1x1x36x290xbf16, #tpu.memory_space<vmem>>, vector<1x1x36x256xbf16>
    %53 = vector.shape_cast %52 : vector<1x1x36x256xbf16> to vector<36x256xbf16>
    %54 = vector.extract_strided_slice %3 {offsets = [0, 0], sizes = [1, 256], strides = [1, 1]} : vector<3x256xbf16> to vector<1x256xbf16>
    %55 = vector.broadcast %54 : vector<1x256xbf16> to vector<36x256xbf16>
    %56 = arith.mulf %53, %55 : vector<36x256xbf16>
    %c6 = arith.constant 6 : index
    %c0_45 = arith.constant 0 : index
    %c0_46 = arith.constant 0 : index
    %57 = vector.load %arg3[%c6, %c0_45, %c0_46] : memref<9x128x36xbf16, #tpu.memory_space<vmem>>, vector<1x128x36xbf16>
    %58 = vector.shape_cast %57 : vector<1x128x36xbf16> to vector<128x36xbf16>
    %cst_47 = arith.constant dense<0.000000e+00> : vector<128x256xf32>
    %59 = tpu.matmul %58, %56, %cst_47 {dimension_numbers = #tpu.dot_dimension_numbers<[1], [0], [0], [1], [0, 0, 1, 1], [], []>} : vector<128x36xbf16>, vector<36x256xbf16>, vector<128x256xf32> -> vector<128x256xf32>
    %60 = arith.addf %51, %59 : vector<128x256xf32>
    %c0_48 = arith.constant 0 : index
    %c0_49 = arith.constant 0 : index
    %c0_50 = arith.constant 0 : index
    %c33 = arith.constant 33 : index
    %61 = vector.load %arg2[%c0_48, %c0_49, %c0_50, %c33] : memref<1x1x36x290xbf16, #tpu.memory_space<vmem>>, vector<1x1x36x256xbf16>
    %62 = vector.shape_cast %61 : vector<1x1x36x256xbf16> to vector<36x256xbf16>
    %c7 = arith.constant 7 : index
    %c0_51 = arith.constant 0 : index
    %c0_52 = arith.constant 0 : index
    %63 = vector.load %arg3[%c7, %c0_51, %c0_52] : memref<9x128x36xbf16, #tpu.memory_space<vmem>>, vector<1x128x36xbf16>
    %64 = vector.shape_cast %63 : vector<1x128x36xbf16> to vector<128x36xbf16>
    %cst_53 = arith.constant dense<0.000000e+00> : vector<128x256xf32>
    %65 = tpu.matmul %64, %62, %cst_53 {dimension_numbers = #tpu.dot_dimension_numbers<[1], [0], [0], [1], [0, 0, 1, 1], [], []>} : vector<128x36xbf16>, vector<36x256xbf16>, vector<128x256xf32> -> vector<128x256xf32>
    %66 = arith.addf %60, %65 : vector<128x256xf32>
    %c0_54 = arith.constant 0 : index
    %c0_55 = arith.constant 0 : index
    %c0_56 = arith.constant 0 : index
    %c34 = arith.constant 34 : index
    %67 = vector.load %arg2[%c0_54, %c0_55, %c0_56, %c34] : memref<1x1x36x290xbf16, #tpu.memory_space<vmem>>, vector<1x1x36x256xbf16>
    %68 = vector.shape_cast %67 : vector<1x1x36x256xbf16> to vector<36x256xbf16>
    %69 = vector.extract_strided_slice %3 {offsets = [2, 0], sizes = [1, 256], strides = [1, 1]} : vector<3x256xbf16> to vector<1x256xbf16>
    %70 = vector.broadcast %69 : vector<1x256xbf16> to vector<36x256xbf16>
    %71 = arith.mulf %68, %70 : vector<36x256xbf16>
    %c8 = arith.constant 8 : index
    %c0_57 = arith.constant 0 : index
    %c0_58 = arith.constant 0 : index
    %72 = vector.load %arg3[%c8, %c0_57, %c0_58] : memref<9x128x36xbf16, #tpu.memory_space<vmem>>, vector<1x128x36xbf16>
    %73 = vector.shape_cast %72 : vector<1x128x36xbf16> to vector<128x36xbf16>
    %cst_59 = arith.constant dense<0.000000e+00> : vector<128x256xf32>
    %74 = tpu.matmul %73, %71, %cst_59 {dimension_numbers = #tpu.dot_dimension_numbers<[1], [0], [0], [1], [0, 0, 1, 1], [], []>} : vector<128x36xbf16>, vector<36x256xbf16>, vector<128x256xf32> -> vector<128x256xf32>
    %75 = arith.addf %66, %74 : vector<128x256xf32>
    %c0_60 = arith.constant 0 : index
    %c0_61 = arith.constant 0 : index
    %c0_62 = arith.constant 0 : index
    %76 = vector.load %arg6[%c0_60, %c0_61, %c0_62] : memref<1x32x256xf32, #tpu.memory_space<vmem>>, vector<1x32x256xf32>
    %77 = vector.shape_cast %76 : vector<1x32x256xf32> to vector<32x256xf32>
    %c0_63 = arith.constant 0 : index
    %c0_64 = arith.constant 0 : index
    %78 = vector.load %arg7[%c0_63, %c0_64] : memref<96x256xf32, #tpu.memory_space<vmem>>, vector<96x256xf32>
    %79 = vector.extract_strided_slice %75 {offsets = [0, 0], sizes = [32, 256], strides = [1, 1]} : vector<128x256xf32> to vector<32x256xf32>
    %80 = vector.extract_strided_slice %75 {offsets = [32, 0], sizes = [32, 256], strides = [1, 1]} : vector<128x256xf32> to vector<32x256xf32>
    %81 = vector.extract_strided_slice %75 {offsets = [64, 0], sizes = [32, 256], strides = [1, 1]} : vector<128x256xf32> to vector<32x256xf32>
    %82 = vector.extract_strided_slice %75 {offsets = [96, 0], sizes = [32, 256], strides = [1, 1]} : vector<128x256xf32> to vector<32x256xf32>
    %83 = vector.extract_strided_slice %78 {offsets = [0, 0], sizes = [32, 256], strides = [1, 1]} : vector<96x256xf32> to vector<32x256xf32>
    %84 = vector.extract_strided_slice %78 {offsets = [32, 0], sizes = [32, 256], strides = [1, 1]} : vector<96x256xf32> to vector<32x256xf32>
    %85 = vector.extract_strided_slice %78 {offsets = [64, 0], sizes = [32, 256], strides = [1, 1]} : vector<96x256xf32> to vector<32x256xf32>
    %86 = arith.mulf %77, %83 : vector<32x256xf32>
    %87 = arith.addf %79, %86 : vector<32x256xf32>
    %88 = arith.negf %87 : vector<32x256xf32>
    %89 = math.exp %88 : vector<32x256xf32>
    %cst_65 = arith.constant 1.000000e+00 : f32
    %90 = vector.broadcast %cst_65 : f32 to vector<32x256xf32>
    %91 = arith.addf %90, %89 : vector<32x256xf32>
    %92 = arith.divf %90, %91 : vector<32x256xf32>
    %93 = arith.mulf %77, %84 : vector<32x256xf32>
    %94 = arith.addf %80, %93 : vector<32x256xf32>
    %95 = arith.negf %94 : vector<32x256xf32>
    %96 = math.exp %95 : vector<32x256xf32>
    %cst_66 = arith.constant 1.000000e+00 : f32
    %97 = vector.broadcast %cst_66 : f32 to vector<32x256xf32>
    %98 = arith.addf %97, %96 : vector<32x256xf32>
    %99 = arith.divf %97, %98 : vector<32x256xf32>
    %100 = arith.mulf %99, %77 : vector<32x256xf32>
    %101 = math.tanh %81 : vector<32x256xf32>
    %102 = arith.mulf %92, %101 : vector<32x256xf32>
    %103 = arith.addf %100, %102 : vector<32x256xf32>
    %104 = arith.mulf %103, %85 : vector<32x256xf32>
    %105 = arith.addf %82, %104 : vector<32x256xf32>
    %106 = arith.negf %105 : vector<32x256xf32>
    %107 = math.exp %106 : vector<32x256xf32>
    %cst_67 = arith.constant 1.000000e+00 : f32
    %108 = vector.broadcast %cst_67 : f32 to vector<32x256xf32>
    %109 = arith.addf %108, %107 : vector<32x256xf32>
    %110 = arith.divf %108, %109 : vector<32x256xf32>
    %c0_68 = arith.constant 0 : index
    %c0_69 = arith.constant 0 : index
    %c0_70 = arith.constant 0 : index
    %111 = vector.load %arg9[%c0_68, %c0_69, %c0_70] : memref<1x32x256xf32, #tpu.memory_space<vmem>>, vector<1x32x256xf32>
    %112 = vector.shape_cast %111 : vector<1x32x256xf32> to vector<32x256xf32>
    %113 = vector.shape_cast %103 : vector<32x256xf32> to vector<1x32x256xf32>
    tpu.vector_store %arg9[%c0_68, %c0_69, %c0_70], %113 {strides = array<i32>} : memref<1x32x256xf32, #tpu.memory_space<vmem>>, vector<1x32x256xf32>,
    %114 = math.tanh %103 : vector<32x256xf32>
    %115 = arith.mulf %110, %114 : vector<32x256xf32>
    %c0_71 = arith.constant 0 : index
    %c0_72 = arith.constant 0 : index
    %c0_73 = arith.constant 0 : index
    %116 = vector.load %arg8[%c0_71, %c0_72, %c0_73] : memref<1x32x256xf32, #tpu.memory_space<vmem>>, vector<1x32x256xf32>
    %117 = vector.shape_cast %116 : vector<1x32x256xf32> to vector<32x256xf32>
    %118 = vector.shape_cast %115 : vector<32x256xf32> to vector<1x32x256xf32>
    tpu.vector_store %arg8[%c0_71, %c0_72, %c0_73], %118 {strides = array<i32>} : memref<1x32x256xf32, #tpu.memory_space<vmem>>, vector<1x32x256xf32>,
    return
  }
  func.func @transform_0(%arg0: i32, %arg1: i32) -> (i32, i32, i32, i32) {
    %c0_i32 = arith.constant 0 : i32
    %c0_i32_0 = arith.constant 0 : i32
    %c0_i32_1 = arith.constant 0 : i32
    return %arg0, %arg1, %c0_i32, %c0_i32_0 : i32, i32, i32, i32
  }
  func.func @transform_1(%arg0: i32, %arg1: i32) -> (i32, i32, i32) {
    %c0_i32 = arith.constant 0 : i32
    %c0_i32_0 = arith.constant 0 : i32
    %c0_i32_1 = arith.constant 0 : i32
    %c0_i32_2 = arith.constant 0 : i32
    return %c0_i32, %c0_i32_0, %c0_i32_1 : i32, i32, i32
  }
  func.func @transform_2(%arg0: i32, %arg1: i32) -> (i32, i32) {
    %c0_i32 = arith.constant 0 : i32
    %c0_i32_0 = arith.constant 0 : i32
    %c0_i32_1 = arith.constant 0 : i32
    return %c0_i32, %c0_i32_0 : i32, i32
  }
  func.func @transform_3(%arg0: i32, %arg1: i32) -> (i32, i32) {
    %c0_i32 = arith.constant 0 : i32
    %c0_i32_0 = arith.constant 0 : i32
    return %c0_i32, %arg1 : i32, i32
  }
  func.func @transform_4(%arg0: i32, %arg1: i32) -> (i32, i32, i32) {
    %c0_i32 = arith.constant 0 : i32
    %c0_i32_0 = arith.constant 0 : i32
    return %arg0, %c0_i32, %arg1 : i32, i32, i32
  }
  func.func @transform_5(%arg0: i32, %arg1: i32) -> (i32, i32) {
    %c0_i32 = arith.constant 0 : i32
    %c0_i32_0 = arith.constant 0 : i32
    return %c0_i32, %arg1 : i32, i32
  }
  func.func @transform_6(%arg0: i32, %arg1: i32) -> (i32, i32, i32) {
    %c0_i32 = arith.constant 0 : i32
    %c0_i32_0 = arith.constant 0 : i32
    return %arg0, %c0_i32, %arg1 : i32, i32, i32
  }
  func.func @transform_7(%arg0: i32, %arg1: i32) -> (i32, i32, i32) {
    %c0_i32 = arith.constant 0 : i32
    %c0_i32_0 = arith.constant 0 : i32
    return %arg0, %c0_i32, %arg1 : i32, i32, i32
  }
}

</mosaic_0001>

<bundles_post_ra>
// kernel: _lambda_.1
= control target key start
LH: loop header
LB: loop body
LE: loop exit
PB: predicated region body
PF: predicated region fallthrough
CT: control target
= control target key end

     0   :  { %s4768_s24 = smov 0   ;;  %s4770_s25 = smov 0   ;;  %s5844_s0 = inlined_call_operand.vmem [shape: bf16[2,1,36,290], index: 0, kind: input, shape index: {}]   ;;  %s5845_s1 = inlined_call_operand.vmem [shape: bf16[9,128,36], index: 1, kind: input, shape index: {}]   ;;  %s5846_s2 = inlined_call_operand.vmem [shape: f32[128,1], index: 2, kind: input, shape index: {}]   ;;  %s5847_s3 = inlined_call_operand.vmem [shape: bf16[3,256], index: 3, kind: input, shape index: {}]   ;;  %s5848_s4 = inlined_call_operand.vmem [shape: f32[2,32,256], index: 4, kind: input, shape index: {}]   ;;  %s5849_s5 = inlined_call_operand.vmem [shape: f32[96,256], index: 5, kind: input, shape index: {}]   ;;  %s5850_s6 = inlined_call_operand.vmem [shape: f32[2,32,256], index: 6, kind: output, shape index: {0}]   ;;  %s5851_s7 = inlined_call_operand.vmem [shape: f32[2,32,256], index: 7, kind: output, shape index: {1}]  }
   0x1   :  { %s4772_s26 = smov 0  }
   0x2 LB: > { %s30_s27 = sadd.s32 1, %s4708_s25  ;;  %p3741_p0 = scmp.ge.s32.totalorder %s4712_s26, 1  ;;  %s4712_s26 = sphi %s4772_s26, %s18_s26   ;;  %s4708_s25 = sphi %s4770_s25, %s5853_s25   ;;  %s4704_s24 = sphi %s4768_s24, %s5852_s24  }
   0x3   : > { %p32_p1 = scmp.ge.s32.totalorder %s30_s27, 2  ;;  %p301_p2 = scmp.lt.s32.totalorder %s4712_s26, 3 }
   0x5   : > { %s5855_s27 = smov (%p32_p1, %s30_s27), 0  ;;  %p302_p3 = pnand %p3741_p0, %p301_p2 }
   0x6   : > { %v3749_v0 = vld.sshfl [vmem:[%s5847_s3] sm:$0x33 pattern:$0x76325410] (!%p302_p3)  ;;  %v535_v1 = vlaneseq (!%p302_p3)  ;;  %p369_p4 = scmp.lt.s32.totalorder (!%p302_p3), %s4704_s24, 1  ;;  %s4714_s11 = smov (!%p302_p3), 18  }
   0x7   : > { %305 = sbr.rel (%p302_p3) target bundleno = 860 (0x35c), region = 44  ;;  %v531_v2 = vcombine.high (!%p302_p3), %v3749_v0, %v3749_v0  ;;  %v533_v3 = vpack.i.b16 (!%p302_p3), %v3749_v0, %v3749_v0  ;;  %s4715_s12 = smov (!%p302_p3), 111   ;;  %vm2065_vm0 = vcmask (!%p302_p3), 146432   ;;  %vm1876_vm1 = vcmask (!%p302_p3), 908288  }
   0x8   : > { %v536_v4 = vshrl.u32 (!%p302_p3), %v535_v1, 7  ;;  %s4716_s13 = smov (!%p302_p3), 32   ;;  %s4717_s14 = smov (!%p302_p3), 110   ;;  %v4718_v53 = vmov (!%p302_p3), 0   ;;  %vm663_vm2 = vcmask (!%p302_p3), 1041408   ;;  %vm638_vm3 = vcmask (!%p302_p3), 293888  }
   0x9   : > { %v540_v5 = vpack.i.b16 (!%p302_p3), %v531_v2, %v531_v2  ;;  %1949 = vmatprep.mubr.bf16.mxu0 (!%p302_p3), %v4718_v53  ;;  %702 = vmatprep.mubr.bf16.mxu1 (!%p302_p3), %v4718_v53  ;;  %s4719_s17 = smov (!%p302_p3), 2   ;;  %s4720_s18 = smov (!%p302_p3), 127   ;;  %vm2377_vm4 = vcmask (!%p302_p3), 261120   ;;  %vm2188_vm5 = vcmask (!%p302_p3), 900096   ;;  %vm1136_vm6 = vcmask (!%p302_p3), 15360  }
   0xa   : > { %v1122_v6 = vsub.s32 (!%p302_p3), 1, %v536_v4  ;;  %v537_v22 = vsub.s32 (!%p302_p3), 0, %v536_v4  ;;  %4464 = vset.pattern.permute.xlu1 (!%p302_p3), %v4718_v53  ;;  %4465 = vset.pattern.permute.xlu0 (!%p302_p3), %v4718_v53  ;;  %s4721_s23 = smov (!%p302_p3), 96   ;;  %vm934_vm7 = vcmask (!%p302_p3), 1039360   ;;  %s4723_s8 = smov (!%p302_p3), 126   ;;  %vm2500_vm8 = vcmask (!%p302_p3), 785408  }
   0xb   : > { %vm1458_vm9 = vcmask (!%p302_p3), 130048   ;;  %s4726_s9 = smov (!%p302_p3), 112   ;;  %vm1259_vm10 = vcmask (!%p302_p3), 1031168   ;;  %vm2950_vm11 = vcmask (!%p302_p3), 277504   ;;  %vm2761_vm12 = vcmask (!%p302_p3), 777216   ;;  %s4727_s29 = smov (!%p302_p3), 94  }
   0xc   : > { %v1123_v7 = vrot.slane (!%p302_p3), %v533_v3, %v1122_v6  ;;  %v1127_v8 = vrot.slane (!%p302_p3), %v540_v5, %v1122_v6  ;;  %v538_v28 = vrot.slane (!%p302_p3), %v533_v3, %v537_v22  ;;  %v545_v29 = vrot.slane (!%p302_p3), %v540_v5, %v537_v22 }
   0xd   : > { %vm1581_vm13 = vcmask (!%p302_p3), 916480   ;;  %vm3073_vm14 = vcmask (!%p302_p3), 769024  }
   0xe   : > { %s5857_s24 = smov (!%p369_p4, %s4704_s24), 1  ;;  %v4803_v11 = vcombine.low %v1123_v7, %v1127_v8  ;;  %v4873_v32 = vcombine.low %v538_v28, %v545_v29 }
   0xf   : > { %s4425_s30 = smul.u32 60, %s5857_s24 }
  0x10   : > { %2062 = vrot.lane.b32.xlu0 %v4803_v11, %s4714_s11 }
  0x11   : > { %s4795_s10 = scalar_lea.vmem %s5844_s0, %s4425_s30 }
  0x12   : > { %v4798_v9 = vld [vmem:[%s4795_s10] sm:$0xff]  ;;  %v4801_v10 = vld [vmem:[%s4795_s10 + $0xc] sm:$0xff]  ;;  %v4806_v12 = vld [vmem:[%s4795_s10 + $0x8] sm:$0xf] }
  0x13   : > { %v4809_v13 = vld [vmem:[%s4795_s10 + $0x18] sm:$0xff]  ;;  %v4812_v14 = vld [vmem:[%s4795_s10 + $0x14] sm:$0xf]  ;;  %v4817_v15 = vcombine.high %v4798_v9, %v4801_v10  ;;  %v4820_v16 = vld [vmem:[%s4795_s10 + $0x24] sm:$0xff]  ;;  %v4835_v20 = vcombine.low %v4798_v9, %v4801_v10  ;;  %v552_v57 = vmul.bf16 %v4873_v32, %v4798_v9  ;;  %v553_v58 = vmul.bf16 %v4873_v32, %v4801_v10 }
  0x14   : > { %v4824_v17 = vcombine.low %v4806_v12, %v4812_v14  ;;  %v4827_v18 = vld [vmem:[%s4795_s10 + $0x20] sm:$0xf]  ;;  %v4830_v19 = vld [vmem:[%s4795_s10 + $0x2c] sm:$0xf]  ;;  %v4840_v21 = vcombine.high %v4809_v13, %v4820_v16  ;;  %v4848_v24 = vld [vmem:[%s4795_s10 + $0x30] sm:$0x33]  ;;  %v4853_v25 = vcombine.low %v4809_v13, %v4820_v16  ;;  %v554_v3 = vmul.bf16 %v4873_v32, %v4809_v13 }
  0x15   : > { %1860 = vrot.lane.b32.xlu0 %v4817_v15, %s4715_s12  ;;  %v4845_v23 = vcombine.low %v4827_v18, %v4830_v19  ;;  %v4858_v26 = vcombine.low %v4848_v24, %v4848_v24  ;;  %v4861_v27 = vld [vmem:[%s4795_s10 + $0x38] sm:$0x3]  ;;  %v4866_v30 = vcombine.high %v4848_v24, %v4848_v24  ;;  %v3760_v63 = vcombine.high %v552_v57, %v553_v58 }
  0x16   : > { %1862 = vrot.lane.b32.xlu1 %v4824_v17, %s4715_s12  ;;  %v4871_v31 = vcombine.low %v4861_v27, %v4861_v27  ;;  %v3759_v2 = vcombine.low %v552_v57, %v553_v58  ;;  %v555_v4 = vmul.bf16 %v4873_v32, %v4820_v16 }
  0x17   : > { %670 = vmatprep.subr.bf16.mxu1 %v3760_v63  ;;  %v4989_v63 = vld [vmem:[%s4795_s10 + $0x38] sm:$0x3] }
  0x18   : > { %671 = vmatpush1.bf16.msra.mxu1 %v3759_v2  ;;  %v3762_v8 = vcombine.high %v554_v3, %v555_v4 }
  0x19   : > { %1866 = vrot.lane.b32.xlu0 %v4840_v21, %s4715_s12 }
  0x1a   : > { %1858 = vrot.lane.b32.xlu1 %v4835_v20, %s4715_s12  ;;  %672 = vmatprep.subr.bf16.mxu1 %v3762_v8 }
  0x1d   : > { %1864 = vrot.lane.b32.xlu0 %v4853_v25, %s4715_s12 }
  0x1e   : > { %1868 = vrot.lane.b32.xlu1 %v4845_v23, %s4715_s12 }
  0x21   : > { %1872 = vrot.lane.b32.xlu0 %v4866_v30, %s4715_s12 }
  0x22   : > { %1870 = vrot.lane.b32.xlu1 %v4858_v26, %s4715_s12 }
  0x25   : > { %2374 = vrot.lane.b32.xlu0 %v4873_v32, %s4716_s13 }
  0x26   : > { %1874 = vrot.lane.b32.xlu1 %v4871_v31, %s4715_s12 }
  0x82   : > { %v2063_v33 = vpop.permute.xlu0 %2062 }
  0x83   : > { %v2064_v34 = vrot.slane %v2063_v33, 4 }
  0x85   : > { %v2066_v36 = vsel %vm2065_vm0, %v2064_v34, %v2063_v33  ;;  %v2070_v37 = vmul.bf16 %v2064_v34, %v4806_v12  ;;  %v2072_v38 = vmul.bf16 %v2064_v34, %v4812_v14  ;;  %v2074_v39 = vmul.bf16 %v2064_v34, %v4827_v18 }
  0x86   : > { %v2076_v40 = vmul.bf16 %v2064_v34, %v4830_v19  ;;  %v2073_v43 = vmul.bf16 %v2066_v36, %v4809_v13  ;;  %v2075_v44 = vmul.bf16 %v2066_v36, %v4820_v16  ;;  %v2069_v46 = vmul.bf16 %v2066_v36, %v4798_v9 }
  0x87   : > { %v1861_v41 = vpop.permute.xlu0 %1860  ;;  %v3969_v42 = vcombine.low %v2070_v37, %v2072_v38  ;;  %v2071_v47 = vmul.bf16 %v2066_v36, %v4801_v10  ;;  %v2077_v61 = vmul.bf16 %v2066_v36, %v4848_v24  ;;  %v2078_v28 = vmul.bf16 %v2064_v34, %v4861_v27  ;;  %v522_v36 = vld [vmem:[%s4795_s10 + $0x30] sm:$0x33]  ;;  %v4480_v34 = vld [vmem:[%s5845_s1 + $0x100] sm:$0xff]  }
  0x88   : > { %v1863_v35 = vpop.permute.xlu1 %1862  ;;  %v3972_v45 = vcombine.low %v2074_v39, %v2076_v40  ;;  %v3971_v52 = vcombine.high %v2073_v43, %v2075_v44  ;;  %v3970_v60 = vcombine.low %v2073_v43, %v2075_v44  ;;  %v556_v38 = vmul.bf16 %v4873_v32, %v522_v36  ;;  %v4934_v39 = vld [vmem:[%s4795_s10 + $0x8] sm:$0xf]  ;;  %v4937_v40 = vld [vmem:[%s4795_s10 + $0x14] sm:$0xf] }
  0x89   : > { %v4887_v49 = vsel %vm1876_vm1, %v1861_v41, %v1863_v35  ;;  %2174 = vrot.lane.b32.xlu0 %v3969_v42, %s4717_s14  ;;  %v3968_v54 = vcombine.high %v2069_v46, %v2071_v47  ;;  %v3967_v0 = vcombine.low %v2069_v46, %v2071_v47  ;;  %v3974_v6 = vcombine.high %v2077_v61, %v2077_v61  ;;  %v4481_v46 = vld [vmem:[%s5845_s1] sm:$0xff]  }
  0x8a   : > { %2180 = vrot.lane.b32.xlu1 %v3972_v45, %s4717_s14  ;;  %1917 = vmatprep.subr.bf16.mxu0 %v4887_v49  ;;  %v3973_v22 = vcombine.low %v2077_v61, %v2077_v61  ;;  %v3761_v35 = vcombine.low %v554_v3, %v555_v4  ;;  %v3764_v42 = vcombine.high %v556_v38, %v556_v38  ;;  %v4960_v47 = vld [vmem:[%s4795_s10 + $0x20] sm:$0xf]  ;;  %v4482_v61 = vld [vmem:[%s5845_s1 + $0x8] sm:$0xff]  }
  0x8b   : > { %v1867_v50 = vpop.permute.xlu0 %1866  ;;  %v3800_v43 = vcombine.low %v4934_v39, %v4937_v40  ;;  %v3763_v44 = vcombine.low %v556_v38, %v556_v38  ;;  %v3806_v4 = vcombine.low %v4989_v63, %v4989_v63 }
  0x8c   : > { %v1859_v48 = vpop.permute.xlu1 %1858  ;;  %673 = vmatpush1.bf16.msra.mxu1 %v3761_v35 }
  0x8d   : > { %v4893_v51 = vsel %vm1876_vm1, %v1859_v48, %v1861_v41  ;;  %2178 = vrot.lane.b32.xlu0 %v3971_v52, %s4717_s14  ;;  %v3975_v41 = vcombine.low %v2078_v28, %v2078_v28  ;;  %3765 = vmatprep.subr.msk.bf16.mxu1 %vm663_vm2, %v3764_v42  ;;  %v665_v45 = vsel %vm663_vm2, %v3763_v44, 0  ;;  %v4963_v48 = vld [vmem:[%s4795_s10 + $0x2c] sm:$0xf] }
  0x8e   : > { %1918 = vmatpush1.bf16.msra.mxu0 %v4893_v51  ;;  %2172 = vrot.lane.b32.xlu1 %v3968_v54, %s4717_s14  ;;  %v3803_v52 = vcombine.low %v4960_v47, %v4963_v48  ;;  %v4973_v54 = vld [vmem:[%s4795_s10 + $0x30] sm:$0x33] }
  0x8f   : > { %v1865_v59 = vpop.permute.xlu0 %1864  ;;  %v3805_v57 = vcombine.high %v4973_v54, %v4973_v54 }
  0x90   : > { %v1869_v55 = vpop.permute.xlu1 %1868  ;;  %v4911_v62 = vsel %vm1876_vm1, %v1865_v59, %v1867_v50  ;;  %675 = vmatpush1.bf16.msra.mxu1 %v665_v45 }
  0x91   : > { %v4901_v56 = vsel %vm1876_vm1, %v1867_v50, %v1869_v55  ;;  %2176 = vrot.lane.b32.xlu0 %v3970_v60, %s4717_s14  ;;  %v3804_v60 = vcombine.low %v4973_v54, %v4973_v54 }
  0x92   : > { %1919 = vmatprep.subr.bf16.mxu0 %v4901_v56  ;;  %2170 = vrot.lane.b32.xlu1 %v3967_v0, %s4717_s14 }
  0x93   : > { %1920 = vmatpush1.bf16.msra.mxu0 %v4911_v62  ;;  %v1873_v5 = vpop.permute.xlu0 %1872  ;;  %3766 = vmatmul.mubr.msk.bf16.vlgmr.msra.gmra.mrb[0].mxu1 %vm638_vm3, %v4481_v46  ;;  %v4485_v46 = vld [vmem:[%s5845_s1 + $0x20] sm:$0xff]  }
  0x94   : > { %v1871_v1 = vpop.permute.xlu1 %1870  ;;  %712 = vmatprep.mubr.bf16.mxu1 %v4718_v53 }
  0x95   : > { %v1881_v7 = vsel %vm1876_vm1, %v1871_v1, %v1873_v5  ;;  %2184 = vrot.lane.b32.xlu0 %v3974_v6, %s4717_s14 }
  0x96   : > { %v4924_v33 = vsel %vm663_vm2, %v1881_v7, 0  ;;  %2182 = vrot.lane.b32.xlu1 %v3973_v22, %s4717_s14 }
  0x97   : > { %v2375_v50 = vpop.permute.xlu0 %2374 }
  0x98   : > { %v1875_v29 = vpop.permute.xlu1 %1874  ;;  %v2376_v55 = vrot.slane %v2375_v50, 4 }
  0x99   : > { %v4929_v37 = vsel %vm1876_vm1, %v1873_v5, %v1875_v29  ;;  %1133 = vrot.lane.b32.xlu0 %v4803_v11, %s4719_s17  ;;  %v4483_v29 = vld [vmem:[%s5845_s1 + $0x10] sm:$0xff]   ;;  %s4725_s17 = smov 95  }
  0x9a   : > { %3934 = vmatprep.subr.msk.bf16.mxu0 %vm663_vm2, %v4929_v37  ;;  %2186 = vrot.lane.b32.xlu1 %v3975_v41, %s4717_s14  ;;  %v2386_v58 = vmul.bf16 %v2376_v55, %v4827_v18  ;;  %v2388_v59 = vmul.bf16 %v2376_v55, %v4830_v19  ;;  %v2378_v0 = vsel %vm2377_vm4, %v2376_v55, %v2375_v50  ;;  %v4486_v50 = vld [vmem:[%s5845_s1 + $0x108] sm:$0xff]   ;;  %s4722_s14 = smov 16  }
  0x9b   : > { %1922 = vmatpush1.bf16.msra.mxu0 %v4924_v33  ;;  %v2381_v2 = vmul.bf16 %v2378_v0, %v4798_v9  ;;  %v2383_v3 = vmul.bf16 %v2378_v0, %v4801_v10  ;;  %v2382_v5 = vmul.bf16 %v2376_v55, %v4806_v12  ;;  %v2384_v6 = vmul.bf16 %v2376_v55, %v4812_v14 }
  0x9c   : > { %v4014_v1 = vcombine.low %v2386_v58, %v2388_v59  ;;  %3767 = vmatmul.mubr.msk.bf16.gmra.mrb[4].mxu1 %vm638_vm3, %v4482_v61  ;;  %v2385_v22 = vmul.bf16 %v2378_v0, %v4809_v13  ;;  %v2387_v28 = vmul.bf16 %v2378_v0, %v4820_v16  ;;  %v2389_v38 = vmul.bf16 %v2378_v0, %v4848_v24  ;;  %v4490_v58 = vld [vmem:[%s5845_s1 + $0x38] sm:$0xff]  }
  0x9d   : > { %920 = vrot.lane.b32.xlu0 %v3800_v43, %s4720_s18  ;;  %722 = vmatprep.mubr.bf16.mxu1 %v4718_v53  ;;  %v4010_v7 = vcombine.high %v2381_v2, %v2383_v3  ;;  %v4011_v8 = vcombine.low %v2382_v5, %v2384_v6  ;;  %v4009_v35 = vcombine.low %v2381_v2, %v2383_v3  ;;  %v4484_v43 = vld [vmem:[%s5845_s1 + $0x18] sm:$0xff]  }
  0x9e   : > { %3935 = vmatmul.mubr.msk.bf16.vlgmr.msra.gmra.mrb[0].mxu0 %vm638_vm3, %v4480_v34  ;;  %918 = vrot.lane.b32.xlu1 %v4817_v15, %s4720_s18  ;;  %v4013_v36 = vcombine.high %v2385_v22, %v2387_v28  ;;  %v4015_v34 = vcombine.low %v2389_v38, %v2389_v38  ;;  %v2390_v41 = vmul.bf16 %v2376_v55, %v4861_v27  ;;  %v4488_v55 = vld [vmem:[%s5845_s1 + $0x110] sm:$0xff]  }
  0x9f   : > { %1959 = vmatprep.mubr.bf16.mxu0 %v4718_v53  ;;  %v4012_v42 = vcombine.low %v2385_v22, %v2387_v28  ;;  %v4016_v45 = vcombine.high %v2389_v38, %v2389_v38 }
  0xa0   : > { %v4017_v44 = vcombine.low %v2390_v41, %v2390_v41 }
  0xa1   : > { %924 = vrot.lane.b32.xlu0 %v4840_v21, %s4720_s18 }
  0xa2   : > { %916 = vrot.lane.b32.xlu1 %v4835_v20, %s4720_s18 }
  0xa4   : > { %3768 = vmatmul.mubr.msk.bf16.gmra.mrb[8].mxu1 %vm638_vm3, %v4483_v29 }
  0xa5   : > { %922 = vrot.lane.b32.xlu0 %v4853_v25, %s4720_s18  ;;  %732 = vmatprep.mubr.bf16.mxu1 %v4718_v53 }
  0xa6   : > { %926 = vrot.lane.b32.xlu1 %v3803_v52, %s4720_s18  ;;  %3936 = vmatmul.mubr.msk.bf16.gmra.mrb[4].mxu0 %vm638_vm3, %v4486_v50  ;;  %v4487_v52 = vld [vmem:[%s5845_s1 + $0x28] sm:$0xff]  }
  0xa7   : > { %1969 = vmatprep.mubr.bf16.mxu0 %v4718_v53 }
  0xa9   : > { %930 = vrot.lane.b32.xlu0 %v3805_v57, %s4720_s18  ;;  %v4489_v57 = vld [vmem:[%s5845_s1 + $0x30] sm:$0xff]  }
  0xaa   : > { %928 = vrot.lane.b32.xlu1 %v3804_v60, %s4720_s18 }
  0xac   : > { %3769 = vmatmul.mubr.msk.bf16.gmra.mrb[12].mxu1 %vm638_vm3, %v4484_v43 }
  0xad   : > { %2492 = vrot.lane.b32.xlu0 %v4014_v1, %s4721_s23  ;;  %742 = vmatprep.mubr.bf16.mxu1 %v4718_v53 }
  0xae   : > { %932 = vrot.lane.b32.xlu1 %v3806_v4, %s4720_s18  ;;  %3937 = vmatmul.mubr.msk.bf16.gmra.mrb[8].mxu0 %vm638_vm3, %v4488_v55 }
  0xaf   : > { %1979 = vmatprep.mubr.bf16.mxu0 %v4718_v53 }
  0xb1   : > { %2484 = vrot.lane.b32.xlu0 %v4010_v7, %s4721_s23 }
  0xb2   : > { %2486 = vrot.lane.b32.xlu1 %v4011_v8, %s4721_s23 }
  0xb4   : > { %3770 = vmatmul.mubr.msk.bf16.gmra.mrb[16].mxu1 %vm638_vm3, %v4485_v46 }
  0xb5   : > { %2482 = vrot.lane.b32.xlu0 %v4009_v35, %s4721_s23  ;;  %752 = vmatprep.mubr.bf16.mxu1 %v4718_v53 }
  0xb6   : > { %2490 = vrot.lane.b32.xlu1 %v4013_v36, %s4721_s23 }
  0xb9   : > { %2494 = vrot.lane.b32.xlu0 %v4015_v34, %s4721_s23 }
  0xba   : > { %2488 = vrot.lane.b32.xlu1 %v4012_v42, %s4721_s23 }
  0xbc   : > { %3771 = vmatmul.mubr.msk.bf16.gmra.mrb[20].mxu1 %vm638_vm3, %v4487_v52 }
  0xbd   : > { %2498 = vrot.lane.b32.xlu0 %v4017_v44, %s4721_s23  ;;  %762 = vmatprep.mubr.bf16.mxu1 %v4718_v53 }
  0xbe   : > { %2496 = vrot.lane.b32.xlu1 %v4016_v45, %s4721_s23 }
  0xc2   : > { %1455 = vrot.lane.b32.xlu1 %v4873_v32, %s4722_s14  ;;  %v4491_v32 = vld [vmem:[%s5845_s1 + $0x118] sm:$0xff]   ;;  %s4724_s14 = smov 34  }
  0xc3   : > { %3938 = vmatmul.mubr.msk.bf16.gmra.mrb[12].mxu0 %vm638_vm3, %v4491_v32  ;;  %v4493_v32 = vld [vmem:[%s5845_s1 + $0x140] sm:$0xff]  }
  0xc4   : > { %3772 = vmatmul.mubr.msk.bf16.gmra.mrb[24].mxu1 %vm638_vm3, %v4489_v57  ;;  %2261 = vmatprep.mubr.bf16.mxu0 %v4718_v53 }
  0xc5   : > { %772 = vmatprep.mubr.bf16.mxu1 %v4718_v53 }
  0xcc   : > { %3773 = vmatmul.mubr.msk.bf16.gmra.mrb[28].mxu1 %vm638_vm3, %v4490_v58 }
  0xcd   : > { %1007 = vmatprep.mubr.bf16.mxu1 %v4718_v53 }
  0xfb   : > { %v2175_v59 = vpop.permute.xlu0 %2174 }
  0xfc   : > { %v2181_v60 = vpop.permute.xlu1 %2180 }
  0xff   : > { %v2179_v61 = vpop.permute.xlu0 %2178 }
 0x100   : > { %v2173_v0 = vpop.permute.xlu1 %2172  ;;  %v2192_v5 = vsel %vm2188_vm5, %v2179_v61, %v2181_v60 }
 0x101   : > { %v2190_v1 = vsel %vm2188_vm5, %v2173_v0, %v2175_v59 }
 0x102   : > { %2229 = vmatprep.subr.bf16.mxu0 %v2190_v1 }
 0x103   : > { %v2177_v2 = vpop.permute.xlu0 %2176 }
 0x104   : > { %v2171_v3 = vpop.permute.xlu1 %2170  ;;  %v2191_v8 = vsel %vm2188_vm5, %v2177_v2, %v2179_v61 }
 0x105   : > { %v2189_v4 = vsel %vm2188_vm5, %v2171_v3, %v2173_v0 }
 0x106   : > { %2230 = vmatpush1.bf16.msra.mxu0 %v2189_v4 }
 0x107   : > { %2231 = vmatprep.subr.bf16.mxu0 %v2192_v5  ;;  %v2185_v6 = vpop.permute.xlu0 %2184  ;;  %v4496_v5 = vld [vmem:[%s5845_s1 + $0x148] sm:$0xff]  }
 0x108   : > { %v2183_v7 = vpop.permute.xlu1 %2182 }
 0x109   : > { %v2193_v22 = vsel %vm2188_vm5, %v2183_v7, %v2185_v6 }
 0x10a   : > { %2232 = vmatpush1.bf16.msra.mxu0 %v2191_v8  ;;  %v2224_v36 = vsel %vm663_vm2, %v2193_v22, 0 }
 0x10b   : > { %v1134_v28 = vpop.permute.xlu0 %1133 }
 0x10c   : > { %v1135_v29 = vrot.slane %v1134_v28, 4  ;;  %v2187_v35 = vpop.permute.xlu1 %2186 }
 0x10d   : > { %v2194_v38 = vsel %vm2188_vm5, %v2185_v6, %v2187_v35 }
 0x10e   : > { %v1137_v34 = vsel %vm1136_vm6, %v1135_v29, %v1134_v28  ;;  %3976 = vmatprep.subr.msk.bf16.mxu0 %vm663_vm2, %v2194_v38  ;;  %v1145_v41 = vmul.bf16 %v1135_v29, %v4960_v47  ;;  %v1147_v42 = vmul.bf16 %v1135_v29, %v4963_v48  ;;  %v1141_v43 = vmul.bf16 %v1135_v29, %v4934_v39 }
 0x10f   : > { %2234 = vmatpush1.bf16.msra.mxu0 %v2224_v36  ;;  %v1143_v44 = vmul.bf16 %v1135_v29, %v4937_v40  ;;  %v921_v45 = vpop.permute.xlu0 %920  ;;  %v1140_v52 = vmul.bf16 %v4798_v9, %v1137_v34  ;;  %v1142_v55 = vmul.bf16 %v4801_v10, %v1137_v34  ;;  %v1144_v47 = vmul.bf16 %v4809_v13, %v1137_v34 }
 0x110   : > { %v919_v46 = vpop.permute.xlu1 %918  ;;  %v3846_v50 = vcombine.low %v1145_v41, %v1147_v42  ;;  %v1146_v48 = vmul.bf16 %v4820_v16, %v1137_v34  ;;  %v1148_v3 = vmul.bf16 %v1137_v34, %v4973_v54  ;;  %v1149_v54 = vmul.bf16 %v1135_v29, %v4989_v63  ;;  %v4498_v63 = vld [vmem:[%s5845_s1 + $0x150] sm:$0xff]  }
 0x111   : > { %v3843_v57 = vcombine.low %v1141_v43, %v1143_v44  ;;  %v936_v39 = vsel %vm934_vm7, %v919_v46, %v921_v45  ;;  %v3842_v59 = vcombine.high %v1140_v52, %v1142_v55  ;;  %v3841_v2 = vcombine.low %v1140_v52, %v1142_v55  ;;  %v4492_v44 = vld [vmem:[%s5845_s1 + $0x40] sm:$0xff]   ;;  %v4500_v55 = vld [vmem:[%s5845_s1 + $0x158] sm:$0xff]  }
 0x112   : > { %1251 = vrot.lane.b32.xlu0 %v3846_v50, %s4723_s8  ;;  %975 = vmatprep.subr.bf16.mxu1 %v936_v39  ;;  %v3845_v61 = vcombine.high %v1144_v47, %v1146_v48  ;;  %v3844_v6 = vcombine.low %v1144_v47, %v1146_v48  ;;  %v3847_v28 = vcombine.low %v1148_v3, %v1148_v3  ;;  %v4502_v48 = vld [vmem:[%s5845_s1 + $0x160] sm:$0xff]  }
 0x113   : > { %1245 = vrot.lane.b32.xlu1 %v3843_v57, %s4723_s8  ;;  %v925_v40 = vpop.permute.xlu0 %924  ;;  %3977 = vmatmul.mubr.msk.bf16.vlgmr.msra.gmra.mrb[0].mxu0 %vm638_vm3, %v4493_v32  ;;  %v3848_v35 = vcombine.high %v1148_v3, %v1148_v3  ;;  %v3849_v41 = vcombine.low %v1149_v54, %v1149_v54  ;;  %v4510_v54 = vld [vmem:[%s5845_s1 + $0x180] sm:$0xff]  }
 0x114   : > { %v917_v58 = vpop.permute.xlu1 %916  ;;  %2271 = vmatprep.mubr.bf16.mxu0 %v4718_v53 }
 0x115   : > { %v935_v60 = vsel %vm934_vm7, %v917_v58, %v919_v46 }
 0x116   : > { %1243 = vrot.lane.b32.xlu0 %v3842_v59, %s4723_s8  ;;  %976 = vmatpush1.bf16.msra.mxu1 %v935_v60 }
 0x117   : > { %1249 = vrot.lane.b32.xlu1 %v3845_v61, %s4723_s8  ;;  %v923_v0 = vpop.permute.xlu0 %922 }
 0x118   : > { %v927_v1 = vpop.permute.xlu1 %926  ;;  %v937_v4 = vsel %vm934_vm7, %v923_v0, %v925_v40 }
 0x119   : > { %v938_v7 = vsel %vm934_vm7, %v925_v40, %v927_v1 }
 0x11a   : > { %1241 = vrot.lane.b32.xlu0 %v3841_v2, %s4723_s8  ;;  %977 = vmatprep.subr.bf16.mxu1 %v938_v7 }
 0x11b   : > { %1247 = vrot.lane.b32.xlu1 %v3844_v6, %s4723_s8  ;;  %v931_v8 = vpop.permute.xlu0 %930  ;;  %978 = vmatpush1.bf16.msra.mxu1 %v937_v4 }
 0x11c   : > { %v929_v22 = vpop.permute.xlu1 %928  ;;  %3978 = vmatmul.mubr.msk.bf16.gmra.mrb[4].mxu0 %vm638_vm3, %v4496_v5  ;;  %v4506_v5 = vld [vmem:[%s5845_s1 + $0x170] sm:$0xff]  }
 0x11d   : > { %v939_v36 = vsel %vm934_vm7, %v929_v22, %v931_v8  ;;  %2281 = vmatprep.mubr.bf16.mxu0 %v4718_v53 }
 0x11e   : > { %1253 = vrot.lane.b32.xlu0 %v3847_v28, %s4723_s8  ;;  %v970_v42 = vsel %vm663_vm2, %v939_v36, 0  ;;  %v4501_v28 = vld [vmem:[%s5845_s1 + $0x68] sm:$0xff]  }
 0x11f   : > { %1255 = vrot.lane.b32.xlu1 %v3848_v35, %s4723_s8  ;;  %v2493_v38 = vpop.permute.xlu0 %2492  ;;  %v4503_v35 = vld [vmem:[%s5845_s1 + $0x70] sm:$0xff]   ;;  %v4512_v36 = vld [vmem:[%s5845_s1 + $0x188] sm:$0xff]  }
 0x120   : > { %v933_v34 = vpop.permute.xlu1 %932 }
 0x121   : > { %v940_v29 = vsel %vm934_vm7, %v931_v8, %v933_v34  ;;  %v4514_v34 = vld [vmem:[%s5845_s1 + $0x190] sm:$0xff]  }
 0x122   : > { %1257 = vrot.lane.b32.xlu0 %v3849_v41, %s4723_s8  ;;  %3807 = vmatprep.subr.msk.bf16.mxu1 %vm663_vm2, %v940_v29  ;;  %v4516_v41 = vld [vmem:[%s5845_s1 + $0x198] sm:$0xff]   ;;  %v4522_v29 = vld [vmem:[%s5845_s1 + $0x1b0] sm:$0xff]  }
 0x123   : > { %2947 = vrot.lane.b32.xlu1 %v4803_v11, %s4724_s14  ;;  %v2485_v43 = vpop.permute.xlu0 %2484  ;;  %980 = vmatpush1.bf16.msra.mxu1 %v970_v42  ;;  %v4518_v42 = vld [vmem:[%s5845_s1 + $0x1a0] sm:$0xff]   ;;  %s5574_s14 = sshll.u32 %s5857_s24, 6 }
 0x124   : > { %v2487_v45 = vpop.permute.xlu1 %2486  ;;  %3979 = vmatmul.mubr.msk.bf16.gmra.mrb[8].mxu0 %vm638_vm3, %v4498_v63  ;;  %v4520_v63 = vld [vmem:[%s5845_s1 + $0x1a8] sm:$0xff]  }
 0x125   : > { %v2502_v46 = vsel %vm2500_vm8, %v2485_v43, %v2487_v45  ;;  %2291 = vmatprep.mubr.bf16.mxu0 %v4718_v53 }
 0x126   : > { %2745 = vrot.lane.b32.xlu0 %v4817_v15, %s4725_s17  ;;  %2541 = vmatprep.subr.bf16.mxu0 %v2502_v46  ;;  %v4524_v46 = vld [vmem:[%s5845_s1 + $0x1b8] sm:$0xff]  }
 0x127   : > { %2747 = vrot.lane.b32.xlu1 %v4824_v17, %s4725_s17  ;;  %v2483_v11 = vpop.permute.xlu0 %2482  ;;  %3808 = vmatmul.mubr.msk.bf16.vlgmr.msra.gmra.mrb[0].mxu1 %vm638_vm3, %v4492_v44  ;;  %v4494_v17 = vld [vmem:[%s5845_s1 + $0x48] sm:$0xff]  }
 0x128   : > { %v2491_v50 = vpop.permute.xlu1 %2490  ;;  %v2501_v52 = vsel %vm2500_vm8, %v2483_v11, %v2485_v43  ;;  %1017 = vmatprep.mubr.bf16.mxu1 %v4718_v53 }
 0x129   : > { %2542 = vmatpush1.bf16.msra.mxu0 %v2501_v52  ;;  %v2504_v32 = vsel %vm2500_vm8, %v2491_v50, %v2493_v38  ;;  %v4505_v38 = vld [vmem:[%s5845_s1 + $0x78] sm:$0xff]  }
 0x12a   : > { %2743 = vrot.lane.b32.xlu0 %v4835_v20, %s4725_s17  ;;  %2543 = vmatprep.subr.bf16.mxu0 %v2504_v32 }
 0x12b   : > { %2751 = vrot.lane.b32.xlu1 %v4840_v21, %s4725_s17  ;;  %v2495_v15 = vpop.permute.xlu0 %2494 }
 0x12c   : > { %v2489_v57 = vpop.permute.xlu1 %2488  ;;  %3980 = vmatmul.mubr.msk.bf16.gmra.mrb[12].mxu0 %vm638_vm3, %v4500_v55 }
 0x12d   : > { %v2503_v47 = vsel %vm2500_vm8, %v2489_v57, %v2491_v50  ;;  %2301 = vmatprep.mubr.bf16.mxu0 %v4718_v53 }
 0x12e   : > { %2753 = vrot.lane.b32.xlu0 %v4845_v23, %s4725_s17  ;;  %2544 = vmatpush1.bf16.msra.mxu0 %v2503_v47 }
 0x12f   : > { %2749 = vrot.lane.b32.xlu1 %v4853_v25, %s4725_s17  ;;  %v2499_v20 = vpop.permute.xlu0 %2498  ;;  %3809 = vmatmul.mubr.msk.bf16.gmra.mrb[4].mxu1 %vm638_vm3, %v4494_v17  ;;  %v4495_v25 = vld [vmem:[%s5845_s1 + $0x50] sm:$0xff]  }
 0x130   : > { %v2497_v21 = vpop.permute.xlu1 %2496  ;;  %1027 = vmatprep.mubr.bf16.mxu1 %v4718_v53 }
 0x131   : > { %v2505_v39 = vsel %vm2500_vm8, %v2495_v15, %v2497_v21  ;;  %v2506_v40 = vsel %vm2500_vm8, %v2497_v21, %v2499_v20 }
 0x132   : > { %2755 = vrot.lane.b32.xlu0 %v4858_v26, %s4725_s17  ;;  %v2536_v23 = vsel %vm663_vm2, %v2505_v39, 0  ;;  %4018 = vmatprep.subr.msk.bf16.mxu0 %vm663_vm2, %v2506_v40 }
 0x133   : > { %2757 = vrot.lane.b32.xlu1 %v4866_v30, %s4725_s17  ;;  %2546 = vmatpush1.bf16.msra.mxu0 %v2536_v23 }
 0x134   : > { %v1456_v58 = vpop.permute.xlu1 %1455  ;;  %3981 = vmatmul.mubr.msk.bf16.gmra.mrb[16].mxu0 %vm638_vm3, %v4502_v48 }
 0x135   : > { %v1457_v59 = vrot.slane %v1456_v58, 4  ;;  %2311 = vmatprep.mubr.bf16.mxu0 %v4718_v53 }
 0x136   : > { %2759 = vrot.lane.b32.xlu0 %v4871_v31, %s4725_s17  ;;  %s5584_s17 = scalar_lea.vmem %s5848_s4, %s5574_s14 }
 0x137   : > { %v1459_v26 = vsel %vm1458_vm9, %v1457_v59, %v1456_v58  ;;  %v1467_v60 = vmul.bf16 %v1457_v59, %v4827_v18  ;;  %v1469_v30 = vmul.bf16 %v1457_v59, %v4830_v19  ;;  %v1463_v61 = vmul.bf16 %v1457_v59, %v4806_v12  ;;  %3810 = vmatmul.mubr.msk.bf16.gmra.mrb[8].mxu1 %vm638_vm3, %v4495_v25  ;;  %v4504_v18 = vld [vmem:[%s5845_s1 + $0x168] sm:$0xff]   ;;  %v4507_v25 = vld [vmem:[%s5845_s1 + $0x80] sm:$0xff]  }
 0x138   : > { %v1465_v0 = vmul.bf16 %v1457_v59, %v4812_v14  ;;  %v1462_v1 = vmul.bf16 %v1459_v26, %v4798_v9  ;;  %v1464_v2 = vmul.bf16 %v1459_v26, %v4801_v10  ;;  %v1466_v3 = vmul.bf16 %v1459_v26, %v4809_v13  ;;  %1037 = vmatprep.mubr.bf16.mxu1 %v4718_v53  ;;  %v4497_v9 = vld [vmem:[%s5845_s1 + $0x58] sm:$0xff]  }
 0x139   : > { %v3888_v31 = vcombine.low %v1467_v60, %v1469_v30  ;;  %v1468_v19 = vmul.bf16 %v1459_v26, %v4820_v16  ;;  %v1470_v16 = vmul.bf16 %v1459_v26, %v4848_v24  ;;  %v1471_v7 = vmul.bf16 %v1457_v59, %v4861_v27  ;;  %v4499_v24 = vld [vmem:[%s5845_s1 + $0x60] sm:$0xff]   ;;  %v4508_v27 = vld [vmem:[%s5845_s1 + $0x178] sm:$0xff]   ;;  %v4680_v59 = vld [vmem:[%s4795_s10 + $0x8] sm:$0xf] }
 0x13a   : > { %v3885_v12 = vcombine.low %v1463_v61, %v1465_v0  ;;  %v3884_v14 = vcombine.high %v1462_v1, %v1464_v2  ;;  %v3883_v13 = vcombine.low %v1462_v1, %v1464_v2  ;;  %v4681_v60 = vld [vmem:[%s4795_s10 + $0x14] sm:$0xf]  ;;  %v4682_v0 = vld [vmem:[%s4795_s10] sm:$0xff]  ;;  %v4683_v2 = vld [vmem:[%s4795_s10 + $0xc] sm:$0xff] }
 0x13b   : > { %1573 = vrot.lane.b32.xlu1 %v3888_v31, %s4726_s9  ;;  %v3887_v10 = vcombine.high %v1466_v3, %v1468_v19  ;;  %v3886_v4 = vcombine.low %v1466_v3, %v1468_v19  ;;  %v3889_v6 = vcombine.low %v1470_v16, %v1470_v16  ;;  %v3890_v8 = vcombine.high %v1470_v16, %v1470_v16  ;;  %v4684_v19 = vld [vmem:[%s4795_s10 + $0x18] sm:$0xff] }
 0x13c   : > { %1567 = vrot.lane.b32.xlu0 %v3885_v12, %s4726_s9  ;;  %3982 = vmatmul.mubr.msk.bf16.gmra.mrb[20].mxu0 %vm638_vm3, %v4504_v18  ;;  %v3891_v22 = vcombine.low %v1471_v7, %v1471_v7  ;;  %v4509_v7 = vld [vmem:[%s5845_s1 + $0x88] sm:$0xff]  }
 0x13d   : > { %2321 = vmatprep.mubr.bf16.mxu0 %v4718_v53 }
 0x13f   : > { %1565 = vrot.lane.b32.xlu1 %v3884_v14, %s4726_s9  ;;  %3811 = vmatmul.mubr.msk.bf16.gmra.mrb[12].mxu1 %vm638_vm3, %v4497_v9  ;;  %v4685_v14 = vld [vmem:[%s4795_s10 + $0x24] sm:$0xff] }
 0x140   : > { %1571 = vrot.lane.b32.xlu0 %v3887_v10, %s4726_s9  ;;  %1047 = vmatprep.mubr.bf16.mxu1 %v4718_v53 }
 0x143   : > { %1563 = vrot.lane.b32.xlu1 %v3883_v13, %s4726_s9 }
 0x144   : > { %1569 = vrot.lane.b32.xlu0 %v3886_v4, %s4726_s9  ;;  %3983 = vmatmul.mubr.msk.bf16.gmra.mrb[24].mxu0 %vm638_vm3, %v4506_v5 }
 0x145   : > { %2331 = vmatprep.mubr.bf16.mxu0 %v4718_v53 }
 0x147   : > { %1575 = vrot.lane.b32.xlu1 %v3889_v6, %s4726_s9  ;;  %3812 = vmatmul.mubr.msk.bf16.gmra.mrb[16].mxu1 %vm638_vm3, %v4499_v24 }
 0x148   : > { %1577 = vrot.lane.b32.xlu0 %v3890_v8, %s4726_s9  ;;  %1057 = vmatprep.mubr.bf16.mxu1 %v4718_v53  ;;  %v4686_v8 = vld [vmem:[%s4795_s10 + $0x20] sm:$0xf] }
 0x14b   : > { %1579 = vrot.lane.b32.xlu1 %v3891_v22, %s4726_s9 }
 0x14c   : > { %3984 = vmatmul.mubr.msk.bf16.gmra.mrb[28].mxu0 %vm638_vm3, %v4508_v27  ;;  %v4687_v27 = vld [vmem:[%s4795_s10 + $0x2c] sm:$0xf] }
 0x14d   : > { %2573 = vmatprep.mubr.bf16.mxu0 %v4718_v53 }
 0x14f   : > { %3813 = vmatmul.mubr.msk.bf16.gmra.mrb[20].mxu1 %vm638_vm3, %v4501_v28 }
 0x150   : > { %1067 = vmatprep.mubr.bf16.mxu1 %v4718_v53 }
 0x154   : > { %4019 = vmatmul.mubr.msk.bf16.vlgmr.msra.gmra.mrb[0].mxu0 %vm638_vm3, %v4510_v54 }
 0x155   : > { %2583 = vmatprep.mubr.bf16.mxu0 %v4718_v53 }
 0x157   : > { %3814 = vmatmul.mubr.msk.bf16.gmra.mrb[24].mxu1 %vm638_vm3, %v4503_v35 }
 0x158   : > { %1077 = vmatprep.mubr.bf16.mxu1 %v4718_v53 }
 0x15c   : > { %4020 = vmatmul.mubr.msk.bf16.gmra.mrb[4].mxu0 %vm638_vm3, %v4512_v36 }
 0x15d   : > { %2593 = vmatprep.mubr.bf16.mxu0 %v4718_v53 }
 0x15f   : > { %3815 = vmatmul.mubr.msk.bf16.gmra.mrb[28].mxu1 %vm638_vm3, %v4505_v38 }
 0x160   : > { %1332 = vmatprep.mubr.bf16.mxu1 %v4718_v53 }
 0x164   : > { %4021 = vmatmul.mubr.msk.bf16.gmra.mrb[8].mxu0 %vm638_vm3, %v4514_v34 }
 0x165   : > { %2603 = vmatprep.mubr.bf16.mxu0 %v4718_v53 }
 0x16c   : > { %4022 = vmatmul.mubr.msk.bf16.gmra.mrb[12].mxu0 %vm638_vm3, %v4516_v41  ;;  %v4688_v41 = vld [vmem:[%s4795_s10 + $0x30] sm:$0x33] }
 0x16d   : > { %2613 = vmatprep.mubr.bf16.mxu0 %v4718_v53 }
 0x174   : > { %4023 = vmatmul.mubr.msk.bf16.gmra.mrb[16].mxu0 %vm638_vm3, %v4518_v42 }
 0x175   : > { %2623 = vmatprep.mubr.bf16.mxu0 %v4718_v53 }
 0x17c   : > { %4024 = vmatmul.mubr.msk.bf16.gmra.mrb[20].mxu0 %vm638_vm3, %v4520_v63 }
 0x17d   : > { %2633 = vmatprep.mubr.bf16.mxu0 %v4718_v53 }
 0x184   : > { %v1252_v43 = vpop.permute.xlu0 %1251  ;;  %4025 = vmatmul.mubr.msk.bf16.gmra.mrb[24].mxu0 %vm638_vm3, %v4522_v29 }
 0x185   : > { %v1246_v44 = vpop.permute.xlu1 %1245  ;;  %2643 = vmatprep.mubr.bf16.mxu0 %v4718_v53 }
 0x188   : > { %v1244_v45 = vpop.permute.xlu0 %1243 }
 0x189   : > { %v1250_v11 = vpop.permute.xlu1 %1249  ;;  %v1261_v50 = vsel %vm1259_vm10, %v1244_v45, %v1246_v44 }
 0x18a   : > { %1300 = vmatprep.subr.bf16.mxu1 %v1261_v50  ;;  %v1263_v15 = vsel %vm1259_vm10, %v1250_v11, %v1252_v43  ;;  %v4689_v50 = vld [vmem:[%s4795_s10 + $0x38] sm:$0x3]  ;;  %s5745_s10 = scalar_lea.vmem %s5851_s7, %s5574_s14 }
 0x18c   : > { %v1242_v52 = vpop.permute.xlu0 %1241  ;;  %4026 = vmatmul.mubr.msk.bf16.gmra.mrb[28].mxu0 %vm638_vm3, %v4524_v46  ;;  %v4511_v46 = vld [vmem:[%s5845_s1 + $0x90] sm:$0xff]  }
 0x18d   : > { %v1260_v55 = vsel %vm1259_vm10, %v1242_v52, %v1244_v45  ;;  %v1248_v32 = vpop.permute.xlu1 %1247  ;;  %2834 = vmatprep.mubr.bf16.mxu0 %v4718_v53 }
 0x18e   : > { %1301 = vmatpush1.bf16.msra.mxu1 %v1260_v55  ;;  %v1262_v57 = vsel %vm1259_vm10, %v1248_v32, %v1250_v11 }
 0x18f   : > { %1302 = vmatprep.subr.bf16.mxu1 %v1263_v15 }
 0x190   : > { %v1254_v17 = vpop.permute.xlu0 %1253 }
 0x191   : > { %v1256_v47 = vpop.permute.xlu1 %1255 }
 0x192   : > { %1303 = vmatpush1.bf16.msra.mxu1 %v1262_v57  ;;  %v1264_v20 = vsel %vm1259_vm10, %v1254_v17, %v1256_v47  ;;  %v4526_v17 = vld [vmem:[%s5845_s1 + $0x1c0] sm:$0xff]  }
 0x193   : > { %v1295_v40 = vsel %vm663_vm2, %v1264_v20, 0  ;;  %v421_v20 = vld [vmem:[%s5846_s2] sm:$0xff] }
 0x194   : > { %v1258_v21 = vpop.permute.xlu0 %1257 }
 0x195   : > { %v1265_v48 = vsel %vm1259_vm10, %v1256_v47, %v1258_v21  ;;  %v2948_v39 = vpop.permute.xlu1 %2947 }
 0x196   : > { %v5260_v23 = vrot.slane %v2948_v39, 4  ;;  %3850 = vmatprep.subr.msk.bf16.mxu1 %vm663_vm2, %v1265_v48  ;;  %v4513_v48 = vld [vmem:[%s5845_s1 + $0x98] sm:$0xff]  }
 0x197   : > { %1305 = vmatpush1.bf16.msra.mxu1 %v1295_v40 }
 0x198   : > { %v2951_v58 = vsel %vm2950_vm11, %v5260_v23, %v2948_v39  ;;  %v2955_v26 = vmul.bf16 %v4680_v59, %v5260_v23  ;;  %v2957_v30 = vmul.bf16 %v4681_v60, %v5260_v23  ;;  %v2746_v61 = vpop.permute.xlu0 %2745  ;;  %v2959_v22 = vmul.bf16 %v4686_v8, %v5260_v23  ;;  %v422_v39 = vld [vmem:[%s5846_s2 + $0x8] sm:$0xff]  ;;  %v423_v59 = vld [vmem:[%s5846_s2 + $0x10] sm:$0xff] }
 0x199   : > { %v2954_v1 = vmul.bf16 %v4682_v0, %v2951_v58  ;;  %v2956_v3 = vmul.bf16 %v4683_v2, %v2951_v58  ;;  %v2748_v18 = vpop.permute.xlu1 %2747  ;;  %v2958_v12 = vmul.bf16 %v4684_v19, %v2951_v58  ;;  %v2960_v9 = vmul.bf16 %v4685_v14, %v2951_v58  ;;  %v4536_v8 = vld [vmem:[%s5845_s1 + $0x1e8] sm:$0xff]  }
 0x19a   : > { %3851 = vmatmul.mubr.msk.bf16.vlgmr.msra.gmra.mrb[0].mxu1 %vm638_vm3, %v4507_v25  ;;  %v4086_v31 = vcombine.low %v2955_v26, %v2957_v30  ;;  %v2763_v5 = vsel %vm2761_vm12, %v2746_v61, %v2748_v18  ;;  %v2961_v28 = vmul.bf16 %v4687_v27, %v5260_v23  ;;  %v2962_v42 = vmul.bf16 %v4688_v41, %v2951_v58  ;;  %v4528_v58 = vld [vmem:[%s5845_s1 + $0x1c8] sm:$0xff]   ;;  %v424_v30 = vld [vmem:[%s5846_s2 + $0x18] sm:$0xff]  ;;  %v4538_v27 = vld [vmem:[%s5845_s1 + $0x1f0] sm:$0xff]  }
 0x19b   : > { %v4085_v10 = vcombine.high %v2954_v1, %v2956_v3  ;;  %1342 = vmatprep.mubr.bf16.mxu1 %v4718_v53  ;;  %v4088_v6 = vcombine.high %v2958_v12, %v2960_v9  ;;  %2802 = vmatprep.subr.bf16.mxu0 %v2763_v5  ;;  %v4084_v24 = vcombine.low %v2954_v1, %v2956_v3  ;;  %v4515_v1 = vld [vmem:[%s5845_s1 + $0xa0] sm:$0xff]   ;;  %v427_v5 = vld [vmem:[%s5846_s2 + $0x30] sm:$0xff]  ;;  %v4529_v41 = vld [vmem:[%s5845_s1 + $0xd8] sm:$0xff]  }
 0x19c   : > { %3059 = vrot.lane.b32.xlu1 %v4086_v31, %s4727_s29  ;;  %v2744_v13 = vpop.permute.xlu0 %2743  ;;  %v4087_v38 = vcombine.low %v2958_v12, %v2960_v9  ;;  %v4089_v63 = vcombine.low %v2959_v22, %v2961_v28  ;;  %v4091_v44 = vcombine.high %v2962_v42, %v2962_v42  ;;  %v4090_v11 = vcombine.low %v2962_v42, %v2962_v42  ;;  %v4530_v31 = vld [vmem:[%s5845_s1 + $0x1d0] sm:$0xff]   ;;  %v425_v9 = vld [vmem:[%s5846_s2 + $0x20] sm:$0xff] }
 0x19d   : > { %3057 = vrot.lane.b32.xlu0 %v4085_v10, %s4727_s29  ;;  %v2762_v16 = vsel %vm2761_vm12, %v2744_v13, %v2746_v61  ;;  %v2752_v4 = vpop.permute.xlu1 %2751  ;;  %v2963_v52 = vmul.bf16 %v4689_v50, %v5260_v23  ;;  %v426_v10 = vld [vmem:[%s5846_s2 + $0x28] sm:$0xff]  ;;  %v4523_v22 = vld [vmem:[%s5845_s1 + $0xc0] sm:$0xff]  }
 0x19e   : > { %2803 = vmatpush1.bf16.msra.mxu0 %v2762_v16  ;;  %v4517_v16 = vld [vmem:[%s5845_s1 + $0xa8] sm:$0xff]   ;;  %v429_v28 = vld [vmem:[%s5846_s2 + $0x40] sm:$0xff] }
 0x19f   : > { %v4092_v57 = vcombine.low %v2963_v52, %v2963_v52  ;;  %v4531_v42 = vld [vmem:[%s5845_s1 + $0xe0] sm:$0xff]  }
 0x1a0   : > { %3063 = vrot.lane.b32.xlu1 %v4088_v6, %s4727_s29  ;;  %v2754_v54 = vpop.permute.xlu0 %2753  ;;  %v428_v6 = vld [vmem:[%s5846_s2 + $0x38] sm:$0xff] }
 0x1a1   : > { %3055 = vrot.lane.b32.xlu0 %v4084_v24, %s4727_s29  ;;  %v2750_v35 = vpop.permute.xlu1 %2749  ;;  %v2765_v36 = vsel %vm2761_vm12, %v2752_v4, %v2754_v54  ;;  %v4521_v24 = vld [vmem:[%s5845_s1 + $0xb8] sm:$0xff]   ;;  %v430_v54 = vld [vmem:[%s5846_s2 + $0x48] sm:$0xff] }
 0x1a2   : > { %3852 = vmatmul.mubr.msk.bf16.gmra.mrb[4].mxu1 %vm638_vm3, %v4509_v7  ;;  %v2764_v34 = vsel %vm2761_vm12, %v2750_v35, %v2752_v4  ;;  %2804 = vmatprep.subr.bf16.mxu0 %v2765_v36  ;;  %v4532_v4 = vld [vmem:[%s5845_s1 + $0x1d8] sm:$0xff]   ;;  %v4534_v7 = vld [vmem:[%s5845_s1 + $0x1e0] sm:$0xff]   ;;  %v4525_v35 = vld [vmem:[%s5845_s1 + $0xc8] sm:$0xff]  }
 0x1a3   : > { %1352 = vmatprep.mubr.bf16.mxu1 %v4718_v53  ;;  %2805 = vmatpush1.bf16.msra.mxu0 %v2764_v34  ;;  %v434_v36 = vld [vmem:[%s5846_s2 + $0x68] sm:$0xff]  ;;  %v436_v34 = vld [vmem:[%s5846_s2 + $0x78] sm:$0xff] }
 0x1a4   : > { %3061 = vrot.lane.b32.xlu1 %v4087_v38, %s4727_s29  ;;  %v2756_v29 = vpop.permute.xlu0 %2755  ;;  %v4527_v38 = vld [vmem:[%s5845_s1 + $0xd0] sm:$0xff]  }
 0x1a5   : > { %3065 = vrot.lane.b32.xlu0 %v4089_v63, %s4727_s29  ;;  %v2758_v43 = vpop.permute.xlu1 %2757  ;;  %v4533_v63 = vld [vmem:[%s5845_s1 + $0xe8] sm:$0xff]  }
 0x1a6   : > { %v2766_v45 = vsel %vm2761_vm12, %v2756_v29, %v2758_v43  ;;  %v4535_v29 = vld [vmem:[%s5845_s1 + $0xf0] sm:$0xff]  }
 0x1a7   : > { %v2797_v55 = vsel %vm663_vm2, %v2766_v45, 0 }
 0x1a8   : > { %3069 = vrot.lane.b32.xlu1 %v4091_v44, %s4727_s29  ;;  %v2760_v32 = vpop.permute.xlu0 %2759  ;;  %v4537_v44 = vld [vmem:[%s5845_s1 + $0xf8] sm:$0xff]  }
 0x1a9   : > { %3067 = vrot.lane.b32.xlu0 %v4090_v11, %s4727_s29  ;;  %v2767_v15 = vsel %vm2761_vm12, %v2758_v43, %v2760_v32  ;;  %v4539_v32 = vld [vmem:[%s5845_s1 + $0x120] sm:$0xff]  }
 0x1aa   : > { %3853 = vmatmul.mubr.msk.bf16.gmra.mrb[8].mxu1 %vm638_vm3, %v4511_v46  ;;  %4051 = vmatprep.subr.msk.bf16.mxu0 %vm663_vm2, %v2767_v15 }
 0x1ab   : > { %1362 = vmatprep.mubr.bf16.mxu1 %v4718_v53  ;;  %2807 = vmatpush1.bf16.msra.mxu0 %v2797_v55 }
 0x1ac   : > { %439 = vperm.xlu1 %4464, %v421_v20  }
 0x1ad   : > { %3071 = vrot.lane.b32.xlu0 %v4092_v57, %s4727_s29  ;;  %v1574_v47 = vpop.permute.xlu1 %1573 }
 0x1ae   : > { %v1568_v21 = vpop.permute.xlu0 %1567  ;;  %4052 = vmatmul.mubr.msk.bf16.vlgmr.msra.gmra.mrb[0].mxu0 %vm638_vm3, %v4526_v17 }
 0x1af   : > { %2844 = vmatprep.mubr.bf16.mxu0 %v4718_v53 }
 0x1b0   : > { %449 = vperm.xlu1 %4464, %v423_v59   ;;  %v4544_v59 = vld [vmem:[%s5845_s1 + $0x208] sm:$0xff]  }
 0x1b1   : > { %v1566_v40 = vpop.permute.xlu1 %1565  ;;  %444 = vperm.xlu0 %4465, %v422_v39  }
 0x1b2   : > { %3854 = vmatmul.mubr.msk.bf16.gmra.mrb[12].mxu1 %vm638_vm3, %v4513_v48  ;;  %v1572_v23 = vpop.permute.xlu0 %1571  ;;  %v1583_v25 = vsel %vm1581_vm13, %v1566_v40, %v1568_v21  ;;  %v4541_v48 = vld [vmem:[%s5845_s1 + $0x128] sm:$0xff]  }
 0x1b3   : > { %1622 = vmatprep.subr.bf16.mxu1 %v1583_v25  ;;  %1372 = vmatprep.mubr.bf16.mxu1 %v4718_v53  ;;  %v1585_v60 = vsel %vm1581_vm13, %v1572_v23, %v1574_v47  ;;  %v4542_v25 = vld [vmem:[%s5845_s1 + $0x200] sm:$0xff]  }
 0x1b4   : > { %454 = vperm.xlu1 %4464, %v424_v30   ;;  %v4547_v30 = vld [vmem:[%s5845_s1 + $0x218] sm:$0xff]  }
 0x1b5   : > { %v1564_v26 = vpop.permute.xlu1 %1563  ;;  %459 = vperm.xlu0 %4465, %v425_v9  }
 0x1b6   : > { %v1582_v61 = vsel %vm1581_vm13, %v1564_v26, %v1566_v40  ;;  %v1570_v0 = vpop.permute.xlu0 %1569  ;;  %4053 = vmatmul.mubr.msk.bf16.gmra.mrb[4].mxu0 %vm638_vm3, %v4528_v58  ;;  %v4543_v58 = vld [vmem:[%s5845_s1 + $0x130] sm:$0xff]   ;;  %v4545_v26 = vld [vmem:[%s5845_s1 + $0x138] sm:$0xff]  }
 0x1b7   : > { %1623 = vmatpush1.bf16.msra.mxu1 %v1582_v61  ;;  %2854 = vmatprep.mubr.bf16.mxu0 %v4718_v53  ;;  %v1584_v2 = vsel %vm1581_vm13, %v1570_v0, %v1572_v23  ;;  %v4548_v61 = vld [vmem:[%s5845_s1 + $0x220] sm:$0xff]   ;;  %v4549_v0 = vld [vmem:[%s5845_s1 + $0x228] sm:$0xff]  }
 0x1b8   : > { %1624 = vmatprep.subr.bf16.mxu1 %v1585_v60  ;;  %464 = vperm.xlu1 %4464, %v426_v10   ;;  %v4546_v60 = vld [vmem:[%s5845_s1 + $0x210] sm:$0xff]  }
 0x1b9   : > { %v1576_v3 = vpop.permute.xlu1 %1575  ;;  %469 = vperm.xlu0 %4465, %v427_v5  }
 0x1ba   : > { %3855 = vmatmul.mubr.msk.bf16.gmra.mrb[16].mxu1 %vm638_vm3, %v4515_v1  ;;  %v1578_v18 = vpop.permute.xlu0 %1577  ;;  %v4550_v1 = vld [vmem:[%s5845_s1 + $0x230] sm:$0xff]  }
 0x1bb   : > { %1625 = vmatpush1.bf16.msra.mxu1 %v1584_v2  ;;  %v1586_v19 = vsel %vm1581_vm13, %v1576_v3, %v1578_v18  ;;  %1382 = vmatprep.mubr.bf16.mxu1 %v4718_v53  ;;  %v4551_v2 = vld [vmem:[%s5845_s1 + $0x238] sm:$0xff]  }
 0x1bc   : > { %v1617_v12 = vsel %vm663_vm2, %v1586_v19, 0  ;;  %474 = vperm.xlu1 %4464, %v428_v6  }
 0x1bd   : > { %v1580_v14 = vpop.permute.xlu1 %1579  ;;  %479 = vperm.xlu0 %4465, %v429_v28  }
 0x1be   : > { %v1587_v13 = vsel %vm1581_vm13, %v1578_v18, %v1580_v14  ;;  %4054 = vmatmul.mubr.msk.bf16.gmra.mrb[8].mxu0 %vm638_vm3, %v4530_v31 }
 0x1bf   : > { %3892 = vmatprep.subr.msk.bf16.mxu1 %vm663_vm2, %v1587_v13  ;;  %2864 = vmatprep.mubr.bf16.mxu0 %v4718_v53 }
 0x1c0   : > { %1627 = vmatpush1.bf16.msra.mxu1 %v1617_v12  ;;  %484 = vperm.xlu1 %4464, %v430_v54   ;;  %v5587_v54 = vld [vmem:[%s5584_s17] sm:$0xff] }
 0x1c1   : > { %4131 = vmatprep.subr.bf16.mxu1 %v4887_v49  ;;  %v4519_v49 = vld [vmem:[%s5845_s1 + $0xb0] sm:$0xff]  }
 0x1c2   : > { %3856 = vmatmul.mubr.msk.bf16.gmra.mrb[20].mxu1 %vm638_vm3, %v4517_v16 }
 0x1c3   : > { %1392 = vmatprep.mubr.bf16.mxu1 %v4718_v53 }
 0x1c6   : > { %4055 = vmatmul.mubr.msk.bf16.gmra.mrb[12].mxu0 %vm638_vm3, %v4532_v4 }
 0x1c7   : > { %2874 = vmatprep.mubr.bf16.mxu0 %v4718_v53 }
 0x1ca   : > { %3857 = vmatmul.mubr.msk.bf16.gmra.mrb[24].mxu1 %vm638_vm3, %v4519_v49 }
 0x1cb   : > { %1402 = vmatprep.mubr.bf16.mxu1 %v4718_v53 }
 0x1ce   : > { %4056 = vmatmul.mubr.msk.bf16.gmra.mrb[16].mxu0 %vm638_vm3, %v4534_v7 }
 0x1cf   : > { %2884 = vmatprep.mubr.bf16.mxu0 %v4718_v53 }
 0x1d2   : > { %3858 = vmatmul.mubr.msk.bf16.gmra.mrb[28].mxu1 %vm638_vm3, %v4521_v24 }
 0x1d3   : > { %1654 = vmatprep.mubr.bf16.mxu1 %v4718_v53 }
 0x1d6   : > { %4057 = vmatmul.mubr.msk.bf16.gmra.mrb[20].mxu0 %vm638_vm3, %v4536_v8 }
 0x1d7   : > { %2894 = vmatprep.mubr.bf16.mxu0 %v4718_v53 }
 0x1da   : > { %3893 = vmatmul.mubr.msk.bf16.vlgmr.msra.gmra.mrb[0].mxu1 %vm638_vm3, %v4523_v22 }
 0x1db   : > { %4134 = vmatpush1.bf16.msra.mxu1 %v4893_v51  ;;  %1664 = vmatprep.mubr.bf16.mxu1 %v4718_v53  ;;  %v431_v51 = vld [vmem:[%s5846_s2 + $0x50] sm:$0xff] }
 0x1dc   : > { %4132 = vmatprep.subr.bf16.mxu1 %v4901_v56  ;;  %v432_v56 = vld [vmem:[%s5846_s2 + $0x58] sm:$0xff]  ;;  %489 = vperm.xlu0 %4465, %v431_v51  }
 0x1dd   : > { %494 = vperm.xlu1 %4464, %v432_v56   ;;  %v5595_v56 = vld [vmem:[%s5584_s17 + $0x8] sm:$0xff] }
 0x1de   : > { %4058 = vmatmul.mubr.msk.bf16.gmra.mrb[24].mxu0 %vm638_vm3, %v4538_v27 }
 0x1df   : > { %4135 = vmatpush1.bf16.msra.mxu1 %v4911_v62  ;;  %2904 = vmatprep.mubr.bf16.mxu0 %v4718_v53  ;;  %v4540_v62 = vld [vmem:[%s5845_s1 + $0x1f8] sm:$0xff]  }
 0x1e0   : > { %4133 = vmatprep.subr.msk.bf16.mxu1 %vm663_vm2, %v4929_v37  ;;  %v433_v37 = vld [vmem:[%s5846_s2 + $0x60] sm:$0xff] }
 0x1e1   : > { %499 = vperm.xlu0 %4465, %v433_v37   ;;  %504 = vperm.xlu1 %4464, %v434_v36  }
 0x1e2   : > { %3894 = vmatmul.mubr.msk.bf16.gmra.mrb[4].mxu1 %vm638_vm3, %v4525_v35  ;;  %v3267_v35 = vld [vmem:[%s5849_s5] sm:$0xff] }
 0x1e3   : > { %4136 = vmatpush1.bf16.msra.mxu1 %v4924_v33  ;;  %1674 = vmatprep.mubr.bf16.mxu1 %v4718_v53  ;;  %v435_v33 = vld [vmem:[%s5846_s2 + $0x70] sm:$0xff] }
 0x1e5   : > { %509 = vperm.xlu0 %4465, %v435_v33   ;;  %514 = vperm.xlu1 %4464, %v436_v34   ;;  %v3269_v33 = vld [vmem:[%s5849_s5 + $0x10] sm:$0xff] }
 0x1e6   : > { %4059 = vmatmul.mubr.msk.bf16.gmra.mrb[28].mxu0 %vm638_vm3, %v4540_v62  ;;  %v3268_v62 = vld [vmem:[%s5849_s5 + $0x8] sm:$0xff] }
 0x1e7   : > { %3146 = vmatprep.mubr.bf16.mxu0 %v4718_v53 }
 0x1ea   : > { %3895 = vmatmul.mubr.msk.bf16.gmra.mrb[8].mxu1 %vm638_vm3, %v4527_v38  ;;  %v5603_v38 = vld [vmem:[%s5584_s17 + $0x10] sm:$0xff] }
 0x1eb   : > { %1684 = vmatprep.mubr.bf16.mxu1 %v4718_v53 }
 0x1f2   : > { %3896 = vmatmul.mubr.msk.bf16.gmra.mrb[12].mxu1 %vm638_vm3, %v4529_v41 }
 0x1f3   : > { %1694 = vmatprep.mubr.bf16.mxu1 %v4718_v53 }
 0x1fa   : > { %3897 = vmatmul.mubr.msk.bf16.gmra.mrb[16].mxu1 %vm638_vm3, %v4531_v42  ;;  %v3291_v42 = vmul.f32 %v3267_v35, %v5587_v54 }
 0x1fb   : > { %1704 = vmatprep.mubr.bf16.mxu1 %v4718_v53 }
 0x202   : > { %3898 = vmatmul.mubr.msk.bf16.gmra.mrb[20].mxu1 %vm638_vm3, %v4533_v63 }
 0x203   : > { %1714 = vmatprep.mubr.bf16.mxu1 %v4718_v53 }
 0x20a   : > { %3899 = vmatmul.mubr.msk.bf16.gmra.mrb[24].mxu1 %vm638_vm3, %v4535_v29  ;;  %v5612_v29 = vld [vmem:[%s5584_s17 + $0x18] sm:$0xff] }
 0x20b   : > { %1724 = vmatprep.mubr.bf16.mxu1 %v4718_v53 }
 0x20e   : > { %v3060_v43 = vpop.permute.xlu1 %3059 }
 0x20f   : > { %v3058_v45 = vpop.permute.xlu0 %3057 }
 0x210   : > { %v3075_v46 = vsel %vm3073_vm14, %v3058_v45, %v3060_v43  ;;  %v3270_v43 = vld [vmem:[%s5849_s5 + $0x18] sm:$0xff] }
 0x211   : > { %3114 = vmatprep.subr.bf16.mxu0 %v3075_v46 }
 0x212   : > { %v3064_v11 = vpop.permute.xlu1 %3063  ;;  %3900 = vmatmul.mubr.msk.bf16.gmra.mrb[28].mxu1 %vm638_vm3, %v4537_v44 }
 0x213   : > { %v3056_v50 = vpop.permute.xlu0 %3055  ;;  %1989 = vmatprep.mubr.bf16.mxu1 %v4718_v53 }
 0x214   : > { %v3074_v52 = vsel %vm3073_vm14, %v3056_v50, %v3058_v45 }
 0x215   : > { %3115 = vmatpush1.bf16.msra.mxu0 %v3074_v52 }
 0x216   : > { %v3062_v55 = vpop.permute.xlu1 %3061 }
 0x217   : > { %v3066_v15 = vpop.permute.xlu0 %3065  ;;  %v3076_v57 = vsel %vm3073_vm14, %v3062_v55, %v3064_v11 }
 0x218   : > { %v3077_v17 = vsel %vm3073_vm14, %v3064_v11, %v3066_v15  ;;  %v3292_v11 = vmul.f32 %v3268_v62, %v5595_v56  ;;  %v5649_v62 = vld [vmem:[%s5584_s17 + $0x38] sm:$0xff] }
 0x219   : > { %3116 = vmatprep.subr.bf16.mxu0 %v3077_v17 }
 0x21a   : > { %3117 = vmatpush1.bf16.msra.mxu0 %v3076_v57  ;;  %3939 = vmatmul.mubr.msk.bf16.vlgmr.msra.gmra.mrb[16].mxu1 %vm638_vm3, %v4539_v32  ;;  %v3070_v47 = vpop.permute.xlu1 %3069  ;;  %v3293_v32 = vmul.f32 %v3269_v33, %v5603_v38 }
 0x21b   : > { %v3068_v20 = vpop.permute.xlu0 %3067  ;;  %1999 = vmatprep.mubr.bf16.mxu1 %v4718_v53 }
 0x21c   : > { %v3078_v21 = vsel %vm3073_vm14, %v3068_v20, %v3070_v47 }
 0x21d   : > { %v3109_v23 = vsel %vm663_vm2, %v3078_v21, 0 }
 0x21f   : > { %v3072_v39 = vpop.permute.xlu0 %3071 }
 0x220   : > { %v3079_v40 = vsel %vm3073_vm14, %v3070_v47, %v3072_v39  ;;  %v3294_v47 = vmul.f32 %v3270_v43, %v5612_v29 }
 0x221   : > { %4093 = vmatprep.subr.msk.bf16.mxu0 %vm663_vm2, %v3079_v40 }
 0x222   : > { %3119 = vmatpush1.bf16.msra.mxu0 %v3109_v23  ;;  %3940 = vmatmul.mubr.msk.bf16.gmra.mrb[20].mxu1 %vm638_vm3, %v4541_v48  ;;  %v5623_v23 = vld [vmem:[%s5584_s17 + $0x20] sm:$0xff] }
 0x223   : > { %2009 = vmatprep.mubr.bf16.mxu1 %v4718_v53 }
 0x225   : > { %4094 = vmatmul.mubr.msk.bf16.vlgmr.msra.gmra.mrb[0].mxu0 %vm638_vm3, %v4542_v25  ;;  %v3271_v25 = vld [vmem:[%s5849_s5 + $0x20] sm:$0xff] }
 0x226   : > { %3156 = vmatprep.mubr.bf16.mxu0 %v4718_v53 }
 0x22a   : > { %3941 = vmatmul.mubr.msk.bf16.gmra.mrb[24].mxu1 %vm638_vm3, %v4543_v58 }
 0x22b   : > { %2019 = vmatprep.mubr.bf16.mxu1 %v4718_v53  ;;  %v440_v28 = vpop.permute.xlu1 %439 }
 0x22d   : > { %4095 = vmatmul.mubr.msk.bf16.gmra.mrb[4].mxu0 %vm638_vm3, %v4544_v59 }
 0x22e   : > { %3166 = vmatprep.mubr.bf16.mxu0 %v4718_v53 }
 0x22f   : > { %v450_v41 = vpop.permute.xlu1 %449 }
 0x230   : > { %v445_v37 = vpop.permute.xlu0 %444 }
 0x232   : > { %3942 = vmatmul.mubr.msk.bf16.gmra.mrb[28].mxu1 %vm638_vm3, %v4545_v26 }
 0x235   : > { %4096 = vmatmul.mubr.msk.bf16.gmra.mrb[8].mxu0 %vm638_vm3, %v4546_v60  ;;  %v5631_v60 = vld [vmem:[%s5584_s17 + $0x28] sm:$0xff] }
 0x236   : > { %3176 = vmatprep.mubr.bf16.mxu0 %v4718_v53 }
 0x23d   : > { %4097 = vmatmul.mubr.msk.bf16.gmra.mrb[12].mxu0 %vm638_vm3, %v4547_v30  ;;  %v3272_v30 = vld [vmem:[%s5849_s5 + $0x28] sm:$0xff] }
 0x23e   : > { %3186 = vmatprep.mubr.bf16.mxu0 %v4718_v53 }
 0x245   : > { %4098 = vmatmul.mubr.msk.bf16.gmra.mrb[16].mxu0 %vm638_vm3, %v4548_v61  ;;  %v455_v61 = vpop.permute.xlu1 %454 }
 0x246   : > { %3196 = vmatprep.mubr.bf16.mxu0 %v4718_v53 }
 0x24d   : > { %4099 = vmatmul.mubr.msk.bf16.gmra.mrb[20].mxu0 %vm638_vm3, %v4549_v0 }
 0x24e   : > { %3206 = vmatprep.mubr.bf16.mxu0 %v4718_v53 }
 0x255   : > { %4100 = vmatmul.mubr.msk.bf16.gmra.mrb[24].mxu0 %vm638_vm3, %v4550_v1 }
 0x256   : > { %3216 = vmatprep.mubr.bf16.mxu0 %v4718_v53 }
 0x25d   : > { %4101 = vmatmul.mubr.msk.bf16.gmra.mrb[28].mxu0 %vm638_vm3, %v4551_v2 }
 0x2ad   : > { %v1656_v3 = vpop.f32.mrb[0].mxu1 }
 0x2ae   : > { %v1658_v18 = vpop.f32.mrb[1].mxu1  ;;  %v4137_v34 = vadd.f32 %v1656_v3, %v440_v28  ;;  %v5639_v3 = vld [vmem:[%s5584_s17 + $0x30] sm:$0xff] }
 0x2af   : > { %v1660_v31 = vpop.f32.mrb[2].mxu1  ;;  %v4139_v44 = vadd.f32 %v1658_v18, %v440_v28  ;;  %v3273_v18 = vld [vmem:[%s5849_s5 + $0x30] sm:$0xff]  ;;  %v3295_v28 = vmul.f32 %v3271_v25, %v5623_v23 }
 0x2b0   : > { %v1662_v19 = vpop.f32.mrb[3].mxu1  ;;  %v4141_v50 = vadd.f32 %v1660_v31, %v445_v37 }
 0x2b1   : > { %v4143_v15 = vadd.f32 %v1662_v19, %v445_v37  ;;  %v3274_v37 = vld [vmem:[%s5849_s5 + $0x38] sm:$0xff] }
 0x2b5   : > { %v5545_v12 = vpop.f32.mrb[4].mxu1 }
 0x2b6   : > { %v5547_v14 = vpop.f32.mrb[5].mxu1  ;;  %v4145_v31 = vadd.f32 %v5545_v12, %v450_v41  ;;  %v3296_v12 = vmul.f32 %v3272_v30, %v5631_v60  ;;  %v3277_v30 = vld [vmem:[%s5849_s5 + $0x50] sm:$0xff] }
 0x2b7   : > { %v5549_v9 = vpop.f32.mrb[6].mxu1  ;;  %v4147_v33 = vadd.f32 %v5547_v14, %v450_v41  ;;  %v3298_v14 = vmul.f32 %v3274_v37, %v5649_v62 }
 0x2b8   : > { %v5551_v10 = vpop.f32.mrb[7].mxu1 }
 0x2bd   : > { %v5553_v53 = vpop.f32.mrb[8].mxu1 }
 0x2be   : > { %v5555_v13 = vpop.f32.mrb[9].mxu1 }
 0x2bf   : > { %v5557_v16 = vpop.f32.mrb[10].mxu1 }
 0x2c0   : > { %v5559_v4 = vpop.f32.mrb[11].mxu1 }
 0x2c5   : > { %v5561_v5 = vpop.f32.mrb[12].mxu1 }
 0x2c6   : > { %v5563_v6 = vpop.f32.mrb[13].mxu1 }
 0x2c7   : > { %v5565_v49 = vpop.f32.mrb[14].mxu1 }
 0x2c8   : > { %v5567_v7 = vpop.f32.mrb[15].mxu1 }
 0x2ed   : > { %v5569_v24 = vpop.f32.mrb[16].mxu1 }
 0x2ee   : > { %v5571_v8 = vpop.f32.mrb[17].mxu1 }
 0x2ef   : > { %v5576_v22 = vpop.f32.mrb[18].mxu1 }
 0x2f0   : > { %v5578_v27 = vpop.f32.mrb[19].mxu1 }
 0x2f5   : > { %v5592_v51 = vpop.f32.mrb[20].mxu1 }
 0x2f6   : > { %v5600_v36 = vpop.f32.mrb[21].mxu1 }
 0x2f7   : > { %v5609_v63 = vpop.f32.mrb[22].mxu1 }
 0x2f8   : > { %v3148_v45 = vpop.f32.mrb[0].mxu0  ;;  %v5617_v46 = vpop.f32.mrb[23].mxu1 }
 0x2f9   : > { %v4138_v52 = vadd.f32 %v4137_v34, %v3148_v45  ;;  %v3150_v55 = vpop.f32.mrb[1].mxu0 }
 0x2fa   : > { %v4140_v17 = vadd.f32 %v4139_v44, %v3150_v55  ;;  %v3152_v57 = vpop.f32.mrb[2].mxu0  ;;  %v4149_v44 = vadd.f32 %v5549_v9, %v455_v61  ;;  %v3275_v9 = vld [vmem:[%s5849_s5 + $0x40] sm:$0xff] }
 0x2fb   : > { %v3299_v20 = vadd.f32 %v4138_v52, %v3291_v42  ;;  %v4142_v21 = vadd.f32 %v4141_v50, %v3152_v57  ;;  %v3154_v48 = vpop.f32.mrb[3].mxu0  ;;  %v3297_v50 = vmul.f32 %v3273_v18, %v5639_v3  ;;  %v4151_v52 = vadd.f32 %v5551_v10, %v455_v61  ;;  %v460_v57 = vpop.permute.xlu0 %459  ;;  %v3276_v10 = vld [vmem:[%s5849_s5 + $0x48] sm:$0xff] }
 0x2fc   : > { %v3300_v39 = vadd.f32 %v4140_v17, %v3292_v11  ;;  %v4144_v40 = vadd.f32 %v4143_v15, %v3154_v48  ;;  %v4153_v61 = vadd.f32 %v5553_v53, %v460_v57 }
 0x2fd   : > { %v4102_v58 = vmul.f32 -1.442695, %v3299_v20  ;;  %v3301_v59 = vadd.f32 %v4142_v21, %v3293_v32  ;;  %v5628_v26 = vpop.f32.mrb[24].mxu1 }
 0x2fe   : > { %v4103_v0 = vmul.f32 -1.442695, %v3300_v39  ;;  %v3302_v1 = vadd.f32 %v4144_v40, %v3294_v47  ;;  %v5636_v2 = vpop.f32.mrb[25].mxu1  ;;  %v465_v40 = vpop.permute.xlu1 %464 }
 0x2ff   : > { %4552 = vpow2.f32 %v4102_v58  ;;  %v4104_v19 = vmul.f32 -1.442695, %v3301_v59  ;;  %v5646_v35 = vpop.f32.mrb[26].mxu1 }
 0x300   : > { %4554 = vpow2.f32 %v4103_v0  ;;  %v4105_v34 = vmul.f32 -1.442695, %v3302_v1  ;;  %v3158_v42 = vpop.f32.mrb[4].mxu0  ;;  %v5655_v43 = vpop.f32.mrb[27].mxu1  ;;  %v3355_v1 = vmul.f32 %v3275_v9, %v5587_v54 }
 0x301   : > { %4556 = vpow2.f32 %v4104_v19  ;;  %v4146_v45 = vadd.f32 %v4145_v31, %v3158_v42  ;;  %v3160_v11 = vpop.f32.mrb[5].mxu0  ;;  %v3278_v31 = vld [vmem:[%s5849_s5 + $0x58] sm:$0xff]  ;;  %v4155_v19 = vadd.f32 %v5555_v13, %v460_v57  ;;  %v4157_v42 = vadd.f32 %v5557_v16, %v465_v40 }
 0x302   : > { %v4148_v55 = vadd.f32 %v4147_v33, %v3160_v11  ;;  %v3162_v32 = vpop.f32.mrb[6].mxu0  ;;  %4558 = vpow2.f32 %v4105_v34  ;;  %v3356_v34 = vmul.f32 %v3276_v10, %v5595_v56 }
 0x303   : > { %v3303_v41 = vadd.f32 %v4146_v45, %v3295_v28  ;;  %v4150_v15 = vadd.f32 %v4149_v44, %v3162_v32  ;;  %v3164_v17 = vpop.f32.mrb[7].mxu0  ;;  %v3357_v45 = vmul.f32 %v3277_v30, %v5603_v38  ;;  %v3358_v32 = vmul.f32 %v3278_v31, %v5612_v29  ;;  %v475_v30 = vpop.permute.xlu1 %474  ;;  %v3282_v31 = vld [vmem:[%s5849_s5 + $0x78] sm:$0xff] }
 0x304   : > { %v3304_v47 = vadd.f32 %v4148_v55, %v3296_v12  ;;  %v4152_v20 = vadd.f32 %v4151_v52, %v3164_v17 }
 0x305   : > { %v4106_v21 = vmul.f32 -1.442695, %v3303_v41  ;;  %v3305_v48 = vadd.f32 %v4150_v15, %v3297_v50  ;;  %v5665_v39 = vpop.f32.mrb[28].mxu1  ;;  %v4159_v50 = vadd.f32 %v5559_v4, %v465_v40 }
 0x306   : > { %v4107_v25 = vmul.f32 -1.442695, %v3304_v47  ;;  %v3306_v58 = vadd.f32 %v4152_v20, %v3298_v14  ;;  %v5670_v59 = vpop.f32.mrb[29].mxu1  ;;  %v3279_v14 = vld [vmem:[%s5849_s5 + $0x60] sm:$0xff]  ;;  %v3280_v47 = vld [vmem:[%s5849_s5 + $0x68] sm:$0xff]  ;;  %v470_v20 = vpop.permute.xlu0 %469 }
 0x307   : > { %4560 = vpow2.f32 %v4106_v21  ;;  %v4108_v0 = vmul.f32 -1.442695, %v3305_v48  ;;  %v5677_v18 = vpop.f32.mrb[30].mxu1  ;;  %v3281_v48 = vld [vmem:[%s5849_s5 + $0x70] sm:$0xff] }
 0x308   : > { %4562 = vpow2.f32 %v4107_v25  ;;  %v4109_v28 = vmul.f32 -1.442695, %v3306_v58  ;;  %v3168_v37 = vpop.f32.mrb[8].mxu0  ;;  %v5683_v33 = vpop.f32.mrb[31].mxu1  ;;  %v3359_v58 = vmul.f32 %v3279_v14, %v5623_v23 }
 0x309   : > { %v4553_v53 = vpop.eup %4552  ;;  %4564 = vpow2.f32 %v4108_v0  ;;  %v4154_v12 = vadd.f32 %v4153_v61, %v3168_v37  ;;  %v3170_v44 = vpop.f32.mrb[9].mxu0  ;;  %v3361_v37 = vmul.f32 %v3281_v48, %v5639_v3 }
 0x30a   : > { %v4555_v11 = vpop.eup %4554  ;;  %v3331_v52 = vadd.f32 1.0, %v4553_v53  ;;  %v4156_v13 = vadd.f32 %v4155_v19, %v3170_v44  ;;  %v3172_v55 = vpop.f32.mrb[10].mxu0  ;;  %4566 = vpow2.f32 %v4109_v28  ;;  %v4161_v19 = vadd.f32 %v5561_v5, %v470_v20 }
 0x30b   : > { %v4557_v41 = vpop.eup %4556  ;;  %v3332_v15 = vadd.f32 1.0, %v4555_v11  ;;  %v3363_v16 = vadd.f32 %v4154_v12, %v3355_v1  ;;  %v4158_v17 = vadd.f32 %v4157_v42, %v3172_v55  ;;  %v3174_v57 = vpop.f32.mrb[11].mxu0  ;;  %v3360_v1 = vmul.f32 %v3280_v47, %v5631_v60 }
 0x30c   : > { %v3333_v4 = vadd.f32 1.0, %v4557_v41  ;;  %v3364_v9 = vadd.f32 %v4156_v13, %v3356_v34  ;;  %v4160_v21 = vadd.f32 %v4159_v50, %v3174_v57  ;;  %v4559_v10 = vpop.eup %4558  ;;  %4568 = vrcp.f32 %v3331_v52  ;;  %v480_v57 = vpop.permute.xlu0 %479 }
 0x30d   : > { %v4110_v40 = vmul.f32 -1.442695, %v3363_v16  ;;  %v3365_v25 = vadd.f32 %v4158_v17, %v3357_v45  ;;  %4570 = vrcp.f32 %v3332_v15  ;;  %v4163_v34 = vadd.f32 %v5563_v6, %v470_v20 }
 0x30e   : > { %v4111_v61 = vmul.f32 -1.442695, %v3364_v9  ;;  %v3366_v0 = vadd.f32 %v4160_v21, %v3358_v32  ;;  %4572 = vrcp.f32 %v3333_v4  ;;  %v3334_v53 = vadd.f32 1.0, %v4559_v10 }
 0x30f   : > { %v4112_v28 = vmul.f32 -1.442695, %v3365_v25  ;;  %4574 = vpow2.f32 %v4110_v40  ;;  %v4165_v45 = vadd.f32 %v5565_v49, %v475_v30  ;;  %v3362_v52 = vmul.f32 %v3282_v31, %v5649_v62 }
 0x310   : > { %v4113_v42 = vmul.f32 -1.442695, %v3366_v0  ;;  %v3178_v12 = vpop.f32.mrb[12].mxu0  ;;  %4576 = vpow2.f32 %v4111_v61  ;;  %v4167_v5 = vadd.f32 %v5567_v7, %v475_v30  ;;  %v485_v7 = vpop.permute.xlu1 %484  ;;  %v4169_v25 = vadd.f32 %v5569_v24, %v480_v57 }
 0x311   : > { %v4561_v44 = vpop.eup %4560  ;;  %v4162_v11 = vadd.f32 %v4161_v19, %v3178_v12  ;;  %v3180_v50 = vpop.f32.mrb[13].mxu0  ;;  %4578 = vpow2.f32 %v4112_v28  ;;  %v4171_v61 = vadd.f32 %v5571_v8, %v480_v57  ;;  %v4173_v19 = vadd.f32 %v5576_v22, %v485_v7 }
 0x312   : > { %v4563_v13 = vpop.eup %4562  ;;  %v3335_v55 = vadd.f32 1.0, %v4561_v44  ;;  %v4164_v32 = vadd.f32 %v4163_v34, %v3180_v50  ;;  %v3182_v14 = vpop.f32.mrb[14].mxu0  ;;  %4580 = vpow2.f32 %v4113_v42 }
 0x313   : > { %v4565_v6 = vpop.eup %4564  ;;  %v3336_v41 = vadd.f32 1.0, %v4563_v13  ;;  %v3367_v15 = vadd.f32 %v4162_v11, %v3359_v58  ;;  %v4166_v16 = vadd.f32 %v4165_v45, %v3182_v14  ;;  %v3184_v17 = vpop.f32.mrb[15].mxu0  ;;  %4582 = vrcp.f32 %v3334_v53 }
 0x314   : > { %v3337_v49 = vadd.f32 1.0, %v4565_v6  ;;  %v3368_v47 = vadd.f32 %v4164_v32, %v3360_v1  ;;  %v4168_v20 = vadd.f32 %v4167_v5, %v3184_v17  ;;  %4584 = vrcp.f32 %v3335_v55  ;;  %v5710_v21 = vpop.eup %4566  ;;  %v490_v50 = vpop.permute.xlu0 %489 }
 0x315   : > { %v4114_v4 = vmul.f32 -1.442695, %v3367_v15  ;;  %v3369_v9 = vadd.f32 %v4166_v16, %v3361_v37  ;;  %4586 = vrcp.f32 %v3336_v41  ;;  %v4175_v53 = vadd.f32 %v5578_v27, %v485_v7  ;;  %v495_v32 = vpop.permute.xlu1 %494 }
 0x316   : > { %v4115_v48 = vmul.f32 -1.442695, %v3368_v47  ;;  %v3370_v10 = vadd.f32 %v4168_v20, %v3362_v52  ;;  %v5712_v40 = vpop.eup %4568  ;;  %4588 = vrcp.f32 %v3337_v49  ;;  %v4177_v6 = vadd.f32 %v5592_v51, %v490_v50 }
 0x317   : > { %v4116_v58 = vmul.f32 -1.442695, %v3369_v9  ;;  %v5715_v30 = vpop.eup %4570  ;;  %4590 = vpow2.f32 %v4114_v4  ;;  %v4179_v15 = vadd.f32 %v5600_v36, %v490_v50  ;;  %v4181_v57 = vadd.f32 %v5609_v63, %v495_v32 }
 0x318   : > { %v4117_v0 = vmul.f32 -1.442695, %v3370_v10  ;;  %v3188_v1 = vpop.f32.mrb[16].mxu0  ;;  %v5718_v31 = vpop.eup %4572  ;;  %4592 = vpow2.f32 %v4115_v48  ;;  %v4183_v4 = vadd.f32 %v5617_v46, %v495_v32  ;;  %v3338_v50 = vadd.f32 1.0, %v5710_v21 }
 0x319   : > { %v4170_v28 = vadd.f32 %v4169_v25, %v3188_v1  ;;  %v3190_v37 = vpop.f32.mrb[17].mxu0  ;;  %v4575_v34 = vpop.eup %4574  ;;  %4594 = vpow2.f32 %v4116_v58 }
 0x31a   : > { %v4172_v24 = vadd.f32 %v4171_v61, %v3190_v37  ;;  %v3192_v42 = vpop.f32.mrb[18].mxu0  ;;  %v4577_v12 = vpop.eup %4576  ;;  %v3395_v44 = vadd.f32 1.0, %v4575_v34  ;;  %4596 = vpow2.f32 %v4117_v0 }
 0x31b   : > { %v4174_v8 = vadd.f32 %v4173_v19, %v3192_v42  ;;  %v3194_v45 = vpop.f32.mrb[19].mxu0  ;;  %v4579_v11 = vpop.eup %4578  ;;  %v3396_v52 = vadd.f32 1.0, %v4577_v12  ;;  %4598 = vtanh.f32 %v4170_v28 }
 0x31c   : > { %v4176_v13 = vadd.f32 %v4175_v53, %v3194_v45  ;;  %v4581_v22 = vpop.eup %4580  ;;  %4600 = vrcp.f32 %v3395_v44  ;;  %v3397_v5 = vadd.f32 1.0, %v4579_v11  ;;  %v500_v58 = vpop.permute.xlu0 %499 }
 0x31d   : > { %v5722_v55 = vpop.eup %4582  ;;  %4602 = vrcp.f32 %v3396_v52  ;;  %v3398_v27 = vadd.f32 1.0, %v4581_v22  ;;  %v4185_v37 = vadd.f32 %v5628_v26, %v500_v58  ;;  %v505_v34 = vpop.permute.xlu1 %504  ;;  %v4187_v42 = vadd.f32 %v5636_v2, %v500_v58  ;;  %v3283_v2 = vld [vmem:[%s5849_s5 + $0x80] sm:$0xff] }
 0x31e   : > { %v5724_v14 = vpop.eup %4584  ;;  %4604 = vrcp.f32 %v3397_v5  ;;  %v4189_v12 = vadd.f32 %v5646_v35, %v505_v34  ;;  %v4191_v11 = vadd.f32 %v5655_v43, %v505_v34 }
 0x31f   : > { %v5727_v41 = vpop.eup %4586  ;;  %4606 = vrcp.f32 %v3398_v27 }
 0x320   : > { %v3198_v16 = vpop.f32.mrb[20].mxu0  ;;  %v5730_v17 = vpop.eup %4588  ;;  %4608 = vtanh.f32 %v4172_v24 }
 0x321   : > { %v4178_v49 = vadd.f32 %v4177_v6, %v3198_v16  ;;  %v3200_v47 = vpop.f32.mrb[21].mxu0  ;;  %v4591_v20 = vpop.eup %4590  ;;  %4610 = vtanh.f32 %v4174_v8 }
 0x322   : > { %v4180_v9 = vadd.f32 %v4179_v15, %v3200_v47  ;;  %v3202_v51 = vpop.f32.mrb[22].mxu0  ;;  %v4593_v7 = vpop.eup %4592  ;;  %v3399_v48 = vadd.f32 1.0, %v4591_v20  ;;  %4612 = vtanh.f32 %v4176_v13 }
 0x323   : > { %v4182_v10 = vadd.f32 %v4181_v57, %v3202_v51  ;;  %v3204_v36 = vpop.f32.mrb[23].mxu0  ;;  %v4595_v25 = vpop.eup %4594  ;;  %v3400_v61 = vadd.f32 1.0, %v4593_v7  ;;  %4614 = vtanh.f32 %v4178_v49 }
 0x324   : > { %v4184_v0 = vadd.f32 %v4183_v4, %v3204_v36  ;;  %v4597_v63 = vpop.eup %4596  ;;  %4616 = vrcp.f32 %v3399_v48  ;;  %v3401_v1 = vadd.f32 1.0, %v4595_v25  ;;  %v510_v6 = vpop.permute.xlu0 %509 }
 0x325   : > { %v4599_v19 = vpop.eup %4598  ;;  %4618 = vrcp.f32 %v3400_v61  ;;  %v3402_v28 = vadd.f32 1.0, %v4597_v63  ;;  %v4193_v7 = vadd.f32 %v5665_v39, %v510_v6  ;;  %v4195_v25 = vadd.f32 %v5670_v59, %v510_v6  ;;  %v515_v58 = vpop.permute.xlu1 %514 }
 0x326   : > { %v4601_v46 = vpop.eup %4600  ;;  %4620 = vrcp.f32 %v3401_v1  ;;  %v3435_v53 = vmul.f32 %v4599_v19, %v5712_v40  ;;  %v4197_v1 = vadd.f32 %v5677_v18, %v515_v58 }
 0x327   : > { %v4603_v24 = vpop.eup %4602  ;;  %4622 = vrcp.f32 %v3402_v28  ;;  %v3419_v8 = vmul.f32 %v4601_v46, %v5587_v54 }
 0x328   : > { %v3208_v44 = vpop.f32.mrb[24].mxu0  ;;  %v4605_v45 = vpop.eup %4604  ;;  %4624 = vtanh.f32 %v4180_v9  ;;  %v3420_v21 = vmul.f32 %v4603_v24, %v5595_v56  ;;  %v3284_v56 = vld [vmem:[%s5849_s5 + $0x88] sm:$0xff] }
 0x329   : > { %v4186_v26 = vadd.f32 %v4185_v37, %v3208_v44  ;;  %v3210_v35 = vpop.f32.mrb[25].mxu0  ;;  %v4607_v40 = vpop.eup %4606  ;;  %4626 = vtanh.f32 %v4182_v10  ;;  %v5750_v54 = vadd.f32 %v3435_v53, %v3419_v8  ;;  %v3421_v5 = vmul.f32 %v4605_v45, %v5603_v38  ;;  %v3287_v53 = vld [vmem:[%s5849_s5 + $0xa0] sm:$0xff] }
 0x32a   : > { %v4188_v43 = vadd.f32 %v4187_v42, %v3210_v35  ;;  %v3212_v52 = vpop.f32.mrb[26].mxu0  ;;  %v4609_v13 = vpop.eup %4608  ;;  %4628 = vtanh.f32 %v4184_v0  ;;  %v3422_v49 = vmul.f32 %v4607_v40, %v5612_v29  ;;  %v4199_v40 = vadd.f32 %v5683_v33, %v515_v58 }
 0x32b   : > { %v4190_v22 = vadd.f32 %v4189_v12, %v3212_v52  ;;  %v3214_v32 = vpop.f32.mrb[27].mxu0  ;;  %v4611_v27 = vpop.eup %4610  ;;  %v3451_v15 = vmul.f32 %v5750_v54, %v3283_v2  ;;  %3515 = vst [vmem:[%s5745_s10] sm:$0xff] %v5750_v54  ;;  %v3436_v16 = vmul.f32 %v4609_v13, %v5715_v30  ;;  %4630 = vrcp.f32 %v3338_v50  ;;  %v3285_v30 = vld [vmem:[%s5849_s5 + $0x90] sm:$0xff] }
 0x32c   : > { %v4192_v57 = vadd.f32 %v4191_v11, %v3214_v32  ;;  %v4613_v47 = vpop.eup %4612  ;;  %v3437_v38 = vmul.f32 %v4611_v27, %v5718_v31  ;;  %v3286_v31 = vld [vmem:[%s5849_s5 + $0x98] sm:$0xff]  ;;  %v3289_v32 = vld [vmem:[%s5849_s5 + $0xb0] sm:$0xff] }
 0x32d   : > { %v4615_v20 = vpop.eup %4614  ;;  %v3459_v4 = vadd.f32 %v4186_v26, %v3451_v15  ;;  %v5763_v9 = vadd.f32 %v3436_v16, %v3420_v21  ;;  %v3438_v51 = vmul.f32 %v4613_v47, %v5722_v55 }
 0x32e   : > { %v4617_v29 = vpop.eup %4616  ;;  %v5770_v48 = vadd.f32 %v3437_v38, %v3421_v5  ;;  %v3439_v10 = vmul.f32 %v4615_v20, %v5724_v14 }
 0x32f   : > { %v4619_v36 = vpop.eup %4618  ;;  %v4118_v61 = vmul.f32 -1.442695, %v3459_v4  ;;  %v3452_v55 = vmul.f32 %v5763_v9, %v3284_v56  ;;  %3516 = vst [vmem:[%s5745_s10 + $0x8] sm:$0xff] %v5763_v9  ;;  %v5780_v0 = vadd.f32 %v3438_v51, %v3422_v49  ;;  %v3423_v59 = vmul.f32 %v4617_v29, %v5623_v23 }
 0x330   : > { %v3218_v39 = vpop.f32.mrb[28].mxu0  ;;  %v4621_v63 = vpop.eup %4620  ;;  %v3453_v19 = vmul.f32 %v5770_v48, %v3285_v30  ;;  %3517 = vst [vmem:[%s5745_s10 + $0x10] sm:$0xff] %v5770_v48  ;;  %v3424_v23 = vmul.f32 %v4619_v36, %v5631_v60  ;;  %v3288_v60 = vld [vmem:[%s5849_s5 + $0xa8] sm:$0xff] }
 0x331   : > { %v4194_v14 = vadd.f32 %v4193_v7, %v3218_v39  ;;  %v3220_v28 = vpop.f32.mrb[29].mxu0  ;;  %v4623_v46 = vpop.eup %4622  ;;  %4632 = vpow2.f32 %v4118_v61  ;;  %v3460_v37 = vadd.f32 %v4188_v43, %v3452_v55  ;;  %v3454_v34 = vmul.f32 %v5780_v0, %v3286_v31  ;;  %3518 = vst [vmem:[%s5745_s10 + $0x18] sm:$0xff] %v5780_v0 }
 0x332   : > { %v4196_v18 = vadd.f32 %v4195_v25, %v3220_v28  ;;  %v3222_v24 = vpop.f32.mrb[30].mxu0  ;;  %v4625_v42 = vpop.eup %4624  ;;  %v3461_v12 = vadd.f32 %v4190_v22, %v3453_v19  ;;  %v5793_v44 = vadd.f32 %v3439_v10, %v3423_v59  ;;  %v3425_v52 = vmul.f32 %v4621_v63, %v5639_v3 }
 0x333   : > { %v3224_v8 = vpop.f32.mrb[31].mxu0  ;;  %v4627_v45 = vpop.eup %4626  ;;  %v4119_v11 = vmul.f32 -1.442695, %v3460_v37  ;;  %v3462_v50 = vadd.f32 %v4192_v57, %v3454_v34  ;;  %v3440_v26 = vmul.f32 %v4625_v42, %v5727_v41  ;;  %v4198_v2 = vadd.f32 %v4197_v1, %v3222_v24 }
 0x334   : > { %v4629_v35 = vpop.eup %4628  ;;  %v4120_v43 = vmul.f32 -1.442695, %v3461_v12  ;;  %v3455_v21 = vmul.f32 %v5793_v44, %v3287_v53  ;;  %3519 = vst [vmem:[%s5745_s10 + $0x20] sm:$0xff] %v5793_v44  ;;  %v3441_v41 = vmul.f32 %v4627_v45, %v5730_v17  ;;  %v4200_v27 = vadd.f32 %v4199_v40, %v3224_v8  ;;  %v3290_v17 = vld [vmem:[%s5849_s5 + $0xb8] sm:$0xff] }
 0x335   : > { %4634 = vpow2.f32 %v4119_v11  ;;  %v4121_v13 = vmul.f32 -1.442695, %v3462_v50  ;;  %v3448_v22 = vadd.f32 %v3440_v26, %v3424_v23  ;;  %v4631_v5 = vpop.eup %4630  ;;  %v3426_v6 = vmul.f32 %v4623_v46, %v5649_v62 }
 0x336   : > { %4636 = vpow2.f32 %v4120_v43  ;;  %v3463_v33 = vadd.f32 %v4194_v14, %v3455_v21  ;;  %v3449_v3 = vadd.f32 %v3441_v41, %v3425_v52  ;;  %v3442_v16 = vmul.f32 %v4631_v5, %v4629_v35 }
 0x337   : > { %4638 = vpow2.f32 %v4121_v13  ;;  %v3456_v15 = vmul.f32 %v3448_v22, %v3288_v60  ;;  %3520 = vst [vmem:[%s5745_s10 + $0x28] sm:$0xff] %v3448_v22 }
 0x338   : > { %v4122_v57 = vmul.f32 -1.442695, %v3463_v33  ;;  %4640 = vtanh.f32 %v5750_v54  ;;  %v3457_v47 = vmul.f32 %v3449_v3, %v3289_v32  ;;  %3521 = vst [vmem:[%s5745_s10 + $0x30] sm:$0xff] %v3449_v3  ;;  %v3450_v56 = vadd.f32 %v3442_v16, %v3426_v6 }
 0x339   : > { %v3464_v49 = vadd.f32 %v4196_v18, %v3456_v15 }
 0x33a   : > { %4642 = vpow2.f32 %v4122_v57  ;;  %v3465_v20 = vadd.f32 %v4198_v2, %v3457_v47  ;;  %v3458_v4 = vmul.f32 %v3450_v56, %v3290_v17  ;;  %3522 = vst [vmem:[%s5745_s10 + $0x38] sm:$0xff] %v3450_v56  ;;  %s5825_s10 = scalar_lea.vmem %s5850_s6, %s5574_s14 }
 0x33b   : > { %v4633_v38 = vpop.eup %4632  ;;  %4644 = vtanh.f32 %v5763_v9  ;;  %v4123_v62 = vmul.f32 -1.442695, %v3464_v49 }
 0x33c   : > { %v3491_v30 = vadd.f32 1.0, %v4633_v38  ;;  %4646 = vtanh.f32 %v5770_v48  ;;  %v4124_v51 = vmul.f32 -1.442695, %v3465_v20  ;;  %v3466_v29 = vadd.f32 %v4200_v27, %v3458_v4 }
 0x33d   : > { %4648 = vpow2.f32 %v4123_v62 }
 0x33e   : > { %4650 = vrcp.f32 %v3491_v30  ;;  %v4125_v7 = vmul.f32 -1.442695, %v3466_v29 }
 0x33f   : > { %v4635_v54 = vpop.eup %4634  ;;  %4652 = vpow2.f32 %v4124_v51 }
 0x340   : > { %v4637_v31 = vpop.eup %4636  ;;  %v3492_v10 = vadd.f32 1.0, %v4635_v54  ;;  %4654 = vtanh.f32 %v5780_v0 }
 0x341   : > { %v4639_v36 = vpop.eup %4638  ;;  %v3493_v9 = vadd.f32 1.0, %v4637_v31  ;;  %4656 = vpow2.f32 %v4125_v7 }
 0x342   : > { %4658 = vrcp.f32 %v3492_v10  ;;  %v3494_v25 = vadd.f32 1.0, %v4639_v36  ;;  %v4641_v58 = vpop.eup %4640 }
 0x343   : > { %4660 = vrcp.f32 %v3493_v9 }
 0x344   : > { %v4643_v48 = vpop.eup %4642  ;;  %4662 = vrcp.f32 %v3494_v25 }
 0x345   : > { %v4645_v61 = vpop.eup %4644  ;;  %v3495_v55 = vadd.f32 1.0, %v4643_v48  ;;  %4664 = vtanh.f32 %v5793_v44 }
 0x346   : > { %v4647_v39 = vpop.eup %4646 }
 0x347   : > { %v4649_v63 = vpop.eup %4648  ;;  %4666 = vrcp.f32 %v3495_v55 }
 0x348   : > { %v4651_v1 = vpop.eup %4650  ;;  %v3496_v0 = vadd.f32 1.0, %v4649_v63  ;;  %4668 = vtanh.f32 %v3448_v22 }
 0x349   : > { %v4653_v19 = vpop.eup %4652  ;;  %v3531_v14 = vmul.f32 %v4651_v1, %v4641_v58 }
 0x34a   : > { %v4655_v59 = vpop.eup %4654  ;;  %4670 = vrcp.f32 %v3496_v0  ;;  %v3497_v28 = vadd.f32 1.0, %v4653_v19 }
 0x34b   : > { %v4657_v46 = vpop.eup %4656  ;;  %3539 = vst [vmem:[%s5825_s10] sm:$0xff] %v3531_v14  ;;  %4672 = vtanh.f32 %v3449_v3 }
 0x34c   : > { %v4659_v37 = vpop.eup %4658  ;;  %4674 = vrcp.f32 %v3497_v28  ;;  %v3498_v34 = vadd.f32 1.0, %v4657_v46 }
 0x34d   : > { %v4661_v53 = vpop.eup %4660  ;;  %v3532_v18 = vmul.f32 %v4659_v37, %v4645_v61  ;;  %4676 = vtanh.f32 %v3450_v56 }
 0x34e   : > { %v4663_v24 = vpop.eup %4662  ;;  %v3533_v42 = vmul.f32 %v4661_v53, %v4647_v39  ;;  %4678 = vrcp.f32 %v3498_v34 }
 0x34f   : > { %3540 = vst [vmem:[%s5825_s10 + $0x8] sm:$0xff] %v3532_v18  ;;  %v3534_v12 = vmul.f32 %v4663_v24, %v4655_v59  ;;  %v4665_v44 = vpop.eup %4664 }
 0x350   : > { %3541 = vst [vmem:[%s5825_s10 + $0x10] sm:$0xff] %v3533_v42 }
 0x351   : > { %v4667_v23 = vpop.eup %4666  ;;  %3542 = vst [vmem:[%s5825_s10 + $0x18] sm:$0xff] %v3534_v12 }
 0x352   : > { %v3535_v8 = vmul.f32 %v4667_v23, %v4665_v44  ;;  %v4669_v45 = vpop.eup %4668 }
 0x354   : > { %v4671_v11 = vpop.eup %4670  ;;  %3543 = vst [vmem:[%s5825_s10 + $0x20] sm:$0xff] %v3535_v8 }
 0x355   : > { %v4673_v50 = vpop.eup %4672  ;;  %v3536_v26 = vmul.f32 %v4671_v11, %v4669_v45 }
 0x356   : > { %v4675_v2 = vpop.eup %4674 }
 0x357   : > { %v4677_v35 = vpop.eup %4676  ;;  %3544 = vst [vmem:[%s5825_s10 + $0x28] sm:$0xff] %v3536_v26  ;;  %v3537_v40 = vmul.f32 %v4675_v2, %v4673_v50 }
 0x358   : > { %v4679_v43 = vpop.eup %4678 }
 0x359   : > { %3545 = vst [vmem:[%s5825_s10 + $0x30] sm:$0xff] %v3537_v40  ;;  %v3538_v21 = vmul.f32 %v4679_v43, %v4677_v35 }
 0x35b   : > { %3546 = vst [vmem:[%s5825_s10 + $0x38] sm:$0xff] %v3538_v21 }
 0x35c PF: > { %s18_s26 = sadd.s32 1, %s4712_s26   ;;  %s5852_s24 = smov %s4708_s25 }
 0x35d   : > { %p15_p5 = scmp.ge.s32.totalorder %s18_s26, 4   ;;  %s5853_s25 = smov %s5855_s27 }
 0x35f   :  { %17 = sbr.rel (!%p15_p5) target bundleno = 2 (0x2), region = 103 }

</bundles_post_ra>
